<compile_context>
chip_gen: v7x
topology: tpu7x:2x2x1
jax: 0.10.0
libtpu: 0.0.40
codegen_flags: <defaults>
</compile_context>

<pallas_src>
import functools

import jax
import jax.numpy as jnp
from jax.experimental import pallas as pl
from jax.experimental.pallas import tpu as pltpu


def _leaky(x):
    # nn.LeakyReLU(0.2)
    return jnp.where(x >= 0, x, 0.2 * x)


def _row_softmax(logits):
    # Row-wise softmax (PyTorch Softmax over the class dim), exact normalization.
    m = jnp.max(logits, axis=-1, keepdims=True)
    e = jnp.exp(logits - m)
    return e / jnp.sum(e, axis=-1, keepdims=True)


def _mlp_generator_kernel(
    # row-tiled inputs
    latent_ref,      # (tile_b, L)           f32
    comp_in_ref,     # (tile_b*C, C+L)       f32  (one-hot || latent)
    # proportion head weights: L -> F -> 2F -> 4F -> C
    wp1_ref, bp1_ref, wp2_ref, bp2_ref, wp3_ref, bp3_ref, wp4_ref, bp4_ref,
    # component head weights: (C+L) -> F -> 2F -> 4F -> K
    wc1_ref, bc1_ref, wc2_ref, bc2_ref, wc3_ref, bc3_ref, wc4_ref, bc4_ref,
    # outputs
    prop_ref,        # (tile_b, C)           f32
    comp_ref,        # (tile_b*C, K)         f32
):
    f32 = jnp.float32
    bf16 = jnp.bfloat16

    def mlp4_softmax(x, w1, b1, w2, b2, w3, b3, w4, b4):
        # 3x (Linear + LeakyReLU) + Linear + row softmax; bf16 matmuls, f32 acc,
        # f32 epilogue (v5e-friendly).
        h = _leaky(jnp.dot(x, w1, preferred_element_type=f32) + b1).astype(bf16)
        h = _leaky(jnp.dot(h, w2, preferred_element_type=f32) + b2).astype(bf16)
        h = _leaky(jnp.dot(h, w3, preferred_element_type=f32) + b3).astype(bf16)
        logits = jnp.dot(h, w4, preferred_element_type=f32) + b4
        return _row_softmax(logits)

    # ---------------- proportion head (M = tile_b) ----------------
    prop_ref[...] = mlp4_softmax(
        latent_ref[...].astype(bf16),
        wp1_ref[...], bp1_ref[...], wp2_ref[...], bp2_ref[...],
        wp3_ref[...], bp3_ref[...], wp4_ref[...], bp4_ref[...],
    ).astype(prop_ref.dtype)

    # -------- conditional component head, batched over components (M = tile_b*C)
    comp_ref[...] = mlp4_softmax(
        comp_in_ref[...].astype(bf16),
        wc1_ref[...], bc1_ref[...], wc2_ref[...], bc2_ref[...],
        wc3_ref[...], bc3_ref[...], wc4_ref[...], bc4_ref[...],
    ).astype(comp_ref.dtype)


def mlp_generator_forward(latent, prop_params, comp_params, n_components, n_classes,
                          tile_b=None):
    """MLPGenerator.forward (conditional=True).

    latent: (B, latent_dim) float32
    returns (proportions (B, 1, n_components), components (B, n_components, n_classes))
    """
    B, L = latent.shape
    C, K = n_components, n_classes

    # Conditional input (one-hot || latent) for every (sample, component) pair,
    # exactly as the PyTorch loop builds it.  Built with cheap XLA ops OUTSIDE
    # the kernel so the kernel's component head is one batched 4-layer MLP.
    onehots = jnp.eye(C, dtype=latent.dtype)
    comp_in = jnp.concatenate(
        [jnp.broadcast_to(onehots[None, :, :], (B, C, C)),
         jnp.broadcast_to(latent[:, None, :], (B, C, L))],
        axis=-1,
    ).reshape(B * C, C + L)

    # Row tiling: >=2 "parallel" grid steps when B allows (v7x megacore),
    # capped at 128 rows so per-step f32 intermediates stay small.
    if tile_b is None:
        tile_b = B if B <= 8 else min(128, max(8, -(-B // 2)))
    grid = (pl.cdiv(B, tile_b),)

    args = (latent, comp_in) + tuple(prop_params) + tuple(comp_params)

    def row_spec(block_rows, cols):
        return pl.BlockSpec((block_rows, cols), lambda r: (r, 0))

    def resident_spec(shape):
        nd = len(shape)
        return pl.BlockSpec(tuple(shape), lambda r, _n=nd: (0,) * _n)

    in_specs = ([row_spec(tile_b, L), row_spec(tile_b * C, C + L)]
                + [resident_spec(a.shape) for a in args[2:]])

    prop, comp = pl.pallas_call(
        _mlp_generator_kernel,
        out_shape=(jax.ShapeDtypeStruct((B, C), jnp.float32),
                   jax.ShapeDtypeStruct((B * C, K), jnp.float32)),
        grid=grid,
        in_specs=in_specs,
        out_specs=(row_spec(tile_b, C), row_spec(tile_b * C, K)),
        compiler_params=pltpu.CompilerParams(dimension_semantics=("parallel",)),
    )(*args)

    # proportion_block(latent).unsqueeze(1); components reshaped to (B, C, K)
    return prop[:, None, :], comp.reshape(B, C, K)


# --------------------- parameter init (matches PyTorch) ---------------------

def kaiming_linear(key, in_dim, out_dim):
    """nn.Linear: kaiming_normal_ weight (fan_in, gain=sqrt(2)); default bias.

    Weight stored as (in, out) = W_pt.T in bfloat16 (MXU-native, halves DMA
    bytes); bias is (1, out) float32.
    """
    wkey, bkey = jax.random.split(key)
    std = (2.0 / in_dim) ** 0.5
    w = (jax.random.normal(wkey, (in_dim, out_dim), jnp.float32) * std).astype(jnp.bfloat16)
    bound = 1.0 / (in_dim ** 0.5)
    b = jax.random.uniform(bkey, (1, out_dim), jnp.float32, -bound, bound)
    return w, b


def init_mlp4(key, dims):
    """dims = [d0, d1, d2, d3, d4]; returns flat tuple (w1,b1,...,w4,b4)."""
    keys = jax.random.split(key, 4)
    params = []
    for k, din, dout in zip(keys, dims[:-1], dims[1:]):
        w, b = kaiming_linear(k, din, dout)
        params.extend([w, b])
    return tuple(params)


# --------------------- pure-JAX reference (same numerics) ---------------------

def _mlp4_softmax_ref(x, params):
    w1, b1, w2, b2, w3, b3, w4, b4 = params
    f32, bf16 = jnp.float32, jnp.bfloat16
    h = x.astype(bf16)
    h = _leaky(jnp.dot(h, w1, preferred_element_type=f32) + b1).astype(bf16)
    h = _leaky(jnp.dot(h, w2, preferred_element_type=f32) + b2).astype(bf16)
    h = _leaky(jnp.dot(h, w3, preferred_element_type=f32) + b3).astype(bf16)
    logits = jnp.dot(h, w4, preferred_element_type=f32) + b4
    return jax.nn.softmax(logits, axis=-1)


def mlp_generator_reference(latent, prop_params, comp_params, n_components, n_classes):
    B, L = latent.shape
    C = n_components
    proportions = _mlp4_softmax_ref(latent, prop_params)[:, None, :]
    onehots = jnp.eye(C, dtype=jnp.float32)
    inputs = jnp.concatenate(
        [jnp.broadcast_to(onehots[None, :, :], (B, C, C)),
         jnp.broadcast_to(latent[:, None, :], (B, C, L))],
        axis=-1).reshape(B * C, C + L)
    components = _mlp4_softmax_ref(inputs, comp_params).reshape(B, C, n_classes)
    return proportions, components


if __name__ == "__main__":
    # Small shapes consistent with the module (n_features = module default 128).
    batch = 2
    latent_dim = 16
    n_components = 4
    n_classes = 8
    n_features = 128

    root = jax.random.PRNGKey(0)
    k_lat, k_prop, k_comp = jax.random.split(root, 3)

    latent = jax.random.normal(k_lat, (batch, latent_dim), jnp.float32)

    # proportion_block: L -> F -> 2F -> 4F -> n_components
    prop_params = init_mlp4(
        k_prop, [latent_dim, n_features, 2 * n_features, 4 * n_features, n_components])
    # component_block.model: (C+L) -> F -> 2F -> 4F -> n_classes
    comp_params = init_mlp4(
        k_comp, [n_components + latent_dim, n_features, 2 * n_features,
                 4 * n_features, n_classes])

    fwd = jax.jit(functools.partial(
        mlp_generator_forward, n_components=n_components, n_classes=n_classes))
    proportions, components = fwd(latent, prop_params, comp_params)
    jax.block_until_ready((proportions, components))

    assert proportions.shape == (batch, 1, n_components)
    assert components.shape == (batch, n_components, n_classes)
    # exact softmax -> rows sum to 1 tightly
    assert jnp.allclose(jnp.sum(proportions, axis=-1), 1.0, atol=1e-3)
    assert jnp.allclose(jnp.sum(components, axis=-1), 1.0, atol=1e-3)

    # cross-check against a pure-JAX reference using the same bf16 weights
    ref_p, ref_c = mlp_generator_reference(
        latent, prop_params, comp_params, n_components, n_classes)
    assert jnp.allclose(proportions, ref_p, atol=2e-2)
    assert jnp.allclose(components, ref_c, atol=2e-2)

    print("KERNEL_OK")
</pallas_src>

<mosaic_0001>
module attributes {stable_mosaic.version = 11 : i64} {
  func.func @_mlp_generator_kernel(%arg0: i32, %arg1: memref<2x16xf32, #tpu.memory_space<vmem>>, %arg2: memref<8x20xf32, #tpu.memory_space<vmem>>, %arg3: memref<16x128xbf16, #tpu.memory_space<vmem>>, %arg4: memref<1x128xf32, #tpu.memory_space<vmem>>, %arg5: memref<128x256xbf16, #tpu.memory_space<vmem>>, %arg6: memref<1x256xf32, #tpu.memory_space<vmem>>, %arg7: memref<256x512xbf16, #tpu.memory_space<vmem>>, %arg8: memref<1x512xf32, #tpu.memory_space<vmem>>, %arg9: memref<512x4xbf16, #tpu.memory_space<vmem>>, %arg10: memref<1x4xf32, #tpu.memory_space<vmem>>, %arg11: memref<20x128xbf16, #tpu.memory_space<vmem>>, %arg12: memref<1x128xf32, #tpu.memory_space<vmem>>, %arg13: memref<128x256xbf16, #tpu.memory_space<vmem>>, %arg14: memref<1x256xf32, #tpu.memory_space<vmem>>, %arg15: memref<256x512xbf16, #tpu.memory_space<vmem>>, %arg16: memref<1x512xf32, #tpu.memory_space<vmem>>, %arg17: memref<512x8xbf16, #tpu.memory_space<vmem>>, %arg18: memref<1x8xf32, #tpu.memory_space<vmem>>, %arg19: memref<2x4xf32, #tpu.memory_space<vmem>>, %arg20: memref<8x8xf32, #tpu.memory_space<vmem>>) attributes {dimension_semantics = [#tpu.dimension_semantics<parallel>], iteration_bounds = array<i64: 1>, scalar_prefetch = 0 : i64, scratch_operands = 0 : i64, tpu.core_type = #tpu.core_type<tc>, window_params = [{transform_indices = @transform_0, window_bounds = array<i64: 2, 16>}, {transform_indices = @transform_1, window_bounds = array<i64: 8, 20>}, {pipeline_mode = #tpu.pipeline_mode<synchronous>, transform_indices = @transform_2, window_bounds = array<i64: 16, 128>}, {pipeline_mode = #tpu.pipeline_mode<synchronous>, transform_indices = @transform_3, window_bounds = array<i64: 1, 128>}, {pipeline_mode = #tpu.pipeline_mode<synchronous>, transform_indices = @transform_4, window_bounds = array<i64: 128, 256>}, {pipeline_mode = #tpu.pipeline_mode<synchronous>, transform_indices = @transform_5, window_bounds = array<i64: 1, 256>}, {pipeline_mode = #tpu.pipeline_mode<synchronous>, transform_indices = @transform_6, window_bounds = array<i64: 256, 512>}, {pipeline_mode = #tpu.pipeline_mode<synchronous>, transform_indices = @transform_7, window_bounds = array<i64: 1, 512>}, {pipeline_mode = #tpu.pipeline_mode<synchronous>, transform_indices = @transform_8, window_bounds = array<i64: 512, 4>}, {pipeline_mode = #tpu.pipeline_mode<synchronous>, transform_indices = @transform_9, window_bounds = array<i64: 1, 4>}, {pipeline_mode = #tpu.pipeline_mode<synchronous>, transform_indices = @transform_10, window_bounds = array<i64: 20, 128>}, {pipeline_mode = #tpu.pipeline_mode<synchronous>, transform_indices = @transform_11, window_bounds = array<i64: 1, 128>}, {pipeline_mode = #tpu.pipeline_mode<synchronous>, transform_indices = @transform_12, window_bounds = array<i64: 128, 256>}, {pipeline_mode = #tpu.pipeline_mode<synchronous>, transform_indices = @transform_13, window_bounds = array<i64: 1, 256>}, {pipeline_mode = #tpu.pipeline_mode<synchronous>, transform_indices = @transform_14, window_bounds = array<i64: 256, 512>}, {pipeline_mode = #tpu.pipeline_mode<synchronous>, transform_indices = @transform_15, window_bounds = array<i64: 1, 512>}, {pipeline_mode = #tpu.pipeline_mode<synchronous>, transform_indices = @transform_16, window_bounds = array<i64: 512, 8>}, {pipeline_mode = #tpu.pipeline_mode<synchronous>, transform_indices = @transform_17, window_bounds = array<i64: 1, 8>}, {transform_indices = @transform_18, window_bounds = array<i64: 2, 4>}, {transform_indices = @transform_19, window_bounds = array<i64: 8, 8>}]} {
    %c0 = arith.constant 0 : index
    %c0_0 = arith.constant 0 : index
    %0 = vector.load %arg1[%c0, %c0_0] : memref<2x16xf32, #tpu.memory_space<vmem>>, vector<2x16xf32>
    %1 = arith.truncf %0 : vector<2x16xf32> to vector<2x16xbf16>
    %c0_1 = arith.constant 0 : index
    %c0_2 = arith.constant 0 : index
    %2 = vector.load %arg3[%c0_1, %c0_2] : memref<16x128xbf16, #tpu.memory_space<vmem>>, vector<16x128xbf16>
    %c0_3 = arith.constant 0 : index
    %c0_4 = arith.constant 0 : index
    %3 = vector.load %arg4[%c0_3, %c0_4] : memref<1x128xf32, #tpu.memory_space<vmem>>, vector<1x128xf32>
    %c0_5 = arith.constant 0 : index
    %c0_6 = arith.constant 0 : index
    %4 = vector.load %arg5[%c0_5, %c0_6] : memref<128x256xbf16, #tpu.memory_space<vmem>>, vector<128x256xbf16>
    %c0_7 = arith.constant 0 : index
    %c0_8 = arith.constant 0 : index
    %5 = vector.load %arg6[%c0_7, %c0_8] : memref<1x256xf32, #tpu.memory_space<vmem>>, vector<1x256xf32>
    %c0_9 = arith.constant 0 : index
    %c0_10 = arith.constant 0 : index
    %6 = vector.load %arg7[%c0_9, %c0_10] : memref<256x512xbf16, #tpu.memory_space<vmem>>, vector<256x512xbf16>
    %c0_11 = arith.constant 0 : index
    %c0_12 = arith.constant 0 : index
    %7 = vector.load %arg8[%c0_11, %c0_12] : memref<1x512xf32, #tpu.memory_space<vmem>>, vector<1x512xf32>
    %c0_13 = arith.constant 0 : index
    %c0_14 = arith.constant 0 : index
    %8 = vector.load %arg9[%c0_13, %c0_14] : memref<512x4xbf16, #tpu.memory_space<vmem>>, vector<512x4xbf16>
    %c0_15 = arith.constant 0 : index
    %c0_16 = arith.constant 0 : index
    %9 = vector.load %arg10[%c0_15, %c0_16] : memref<1x4xf32, #tpu.memory_space<vmem>>, vector<1x4xf32>
    %cst = arith.constant dense<0.000000e+00> : vector<2x128xf32>
    %10 = tpu.matmul %1, %2, %cst {dimension_numbers = #tpu.dot_dimension_numbers<[1], [0], [0], [1], [0, 0, 1, 1], [], []>} : vector<2x16xbf16>, vector<16x128xbf16>, vector<2x128xf32> -> vector<2x128xf32>
    %11 = vector.broadcast %3 : vector<1x128xf32> to vector<2x128xf32>
    %12 = arith.addf %10, %11 : vector<2x128xf32>
    %cst_17 = arith.constant 0.000000e+00 : f32
    %13 = vector.broadcast %cst_17 : f32 to vector<2x128xf32>
    %14 = arith.cmpf oge, %12, %13 : vector<2x128xf32>
    %cst_18 = arith.constant 2.000000e-01 : f32
    %15 = vector.broadcast %cst_18 : f32 to vector<2x128xf32>
    %16 = arith.mulf %15, %12 : vector<2x128xf32>
    %17 = arith.select %14, %12, %16 : vector<2x128xi1>, vector<2x128xf32>
    %18 = arith.truncf %17 : vector<2x128xf32> to vector<2x128xbf16>
    %cst_19 = arith.constant dense<0.000000e+00> : vector<2x256xf32>
    %19 = tpu.matmul %18, %4, %cst_19 {dimension_numbers = #tpu.dot_dimension_numbers<[1], [0], [0], [1], [0, 0, 1, 1], [], []>} : vector<2x128xbf16>, vector<128x256xbf16>, vector<2x256xf32> -> vector<2x256xf32>
    %20 = vector.broadcast %5 : vector<1x256xf32> to vector<2x256xf32>
    %21 = arith.addf %19, %20 : vector<2x256xf32>
    %cst_20 = arith.constant 0.000000e+00 : f32
    %22 = vector.broadcast %cst_20 : f32 to vector<2x256xf32>
    %23 = arith.cmpf oge, %21, %22 : vector<2x256xf32>
    %cst_21 = arith.constant 2.000000e-01 : f32
    %24 = vector.broadcast %cst_21 : f32 to vector<2x256xf32>
    %25 = arith.mulf %24, %21 : vector<2x256xf32>
    %26 = arith.select %23, %21, %25 : vector<2x256xi1>, vector<2x256xf32>
    %27 = arith.truncf %26 : vector<2x256xf32> to vector<2x256xbf16>
    %cst_22 = arith.constant dense<0.000000e+00> : vector<2x512xf32>
    %28 = tpu.matmul %27, %6, %cst_22 {dimension_numbers = #tpu.dot_dimension_numbers<[1], [0], [0], [1], [0, 0, 1, 1], [], []>} : vector<2x256xbf16>, vector<256x512xbf16>, vector<2x512xf32> -> vector<2x512xf32>
    %29 = vector.broadcast %7 : vector<1x512xf32> to vector<2x512xf32>
    %30 = arith.addf %28, %29 : vector<2x512xf32>
    %cst_23 = arith.constant 0.000000e+00 : f32
    %31 = vector.broadcast %cst_23 : f32 to vector<2x512xf32>
    %32 = arith.cmpf oge, %30, %31 : vector<2x512xf32>
    %cst_24 = arith.constant 2.000000e-01 : f32
    %33 = vector.broadcast %cst_24 : f32 to vector<2x512xf32>
    %34 = arith.mulf %33, %30 : vector<2x512xf32>
    %35 = arith.select %32, %30, %34 : vector<2x512xi1>, vector<2x512xf32>
    %36 = arith.truncf %35 : vector<2x512xf32> to vector<2x512xbf16>
    %cst_25 = arith.constant dense<0.000000e+00> : vector<2x4xf32>
    %37 = tpu.matmul %36, %8, %cst_25 {dimension_numbers = #tpu.dot_dimension_numbers<[1], [0], [0], [1], [0, 0, 1, 1], [], []>} : vector<2x512xbf16>, vector<512x4xbf16>, vector<2x4xf32> -> vector<2x4xf32>
    %38 = vector.broadcast %9 : vector<1x4xf32> to vector<2x4xf32>
    %39 = arith.addf %37, %38 : vector<2x4xf32>
    %cst_26 = arith.constant dense<0xFF800000> : vector<2xf32>
    %40 = vector.multi_reduction <maximumf>, %39, %cst_26 [1] : vector<2x4xf32> to vector<2xf32>
    %41 = vector.shape_cast %40 : vector<2xf32> to vector<2x1xf32>
    %42 = vector.broadcast %41 : vector<2x1xf32> to vector<2x4xf32>
    %43 = arith.subf %39, %42 : vector<2x4xf32>
    %44 = math.exp %43 : vector<2x4xf32>
    %cst_27 = arith.constant dense<0.000000e+00> : vector<2xf32>
    %45 = vector.multi_reduction <add>, %44, %cst_27 [1] : vector<2x4xf32> to vector<2xf32>
    %46 = vector.shape_cast %45 : vector<2xf32> to vector<2x1xf32>
    %47 = vector.broadcast %46 : vector<2x1xf32> to vector<2x4xf32>
    %48 = arith.divf %44, %47 : vector<2x4xf32>
    %c0_28 = arith.constant 0 : index
    %c0_29 = arith.constant 0 : index
    %49 = vector.load %arg19[%c0_28, %c0_29] : memref<2x4xf32, #tpu.memory_space<vmem>>, vector<2x4xf32>
    tpu.vector_store %arg19[%c0_28, %c0_29], %48 {strides = array<i32>} : memref<2x4xf32, #tpu.memory_space<vmem>>, vector<2x4xf32>,
    %c0_30 = arith.constant 0 : index
    %c0_31 = arith.constant 0 : index
    %50 = vector.load %arg2[%c0_30, %c0_31] : memref<8x20xf32, #tpu.memory_space<vmem>>, vector<8x20xf32>
    %51 = arith.truncf %50 : vector<8x20xf32> to vector<8x20xbf16>
    %c0_32 = arith.constant 0 : index
    %c0_33 = arith.constant 0 : index
    %52 = vector.load %arg11[%c0_32, %c0_33] : memref<20x128xbf16, #tpu.memory_space<vmem>>, vector<20x128xbf16>
    %c0_34 = arith.constant 0 : index
    %c0_35 = arith.constant 0 : index
    %53 = vector.load %arg12[%c0_34, %c0_35] : memref<1x128xf32, #tpu.memory_space<vmem>>, vector<1x128xf32>
    %c0_36 = arith.constant 0 : index
    %c0_37 = arith.constant 0 : index
    %54 = vector.load %arg13[%c0_36, %c0_37] : memref<128x256xbf16, #tpu.memory_space<vmem>>, vector<128x256xbf16>
    %c0_38 = arith.constant 0 : index
    %c0_39 = arith.constant 0 : index
    %55 = vector.load %arg14[%c0_38, %c0_39] : memref<1x256xf32, #tpu.memory_space<vmem>>, vector<1x256xf32>
    %c0_40 = arith.constant 0 : index
    %c0_41 = arith.constant 0 : index
    %56 = vector.load %arg15[%c0_40, %c0_41] : memref<256x512xbf16, #tpu.memory_space<vmem>>, vector<256x512xbf16>
    %c0_42 = arith.constant 0 : index
    %c0_43 = arith.constant 0 : index
    %57 = vector.load %arg16[%c0_42, %c0_43] : memref<1x512xf32, #tpu.memory_space<vmem>>, vector<1x512xf32>
    %c0_44 = arith.constant 0 : index
    %c0_45 = arith.constant 0 : index
    %58 = vector.load %arg17[%c0_44, %c0_45] : memref<512x8xbf16, #tpu.memory_space<vmem>>, vector<512x8xbf16>
    %c0_46 = arith.constant 0 : index
    %c0_47 = arith.constant 0 : index
    %59 = vector.load %arg18[%c0_46, %c0_47] : memref<1x8xf32, #tpu.memory_space<vmem>>, vector<1x8xf32>
    %cst_48 = arith.constant dense<0.000000e+00> : vector<8x128xf32>
    %60 = tpu.matmul %51, %52, %cst_48 {dimension_numbers = #tpu.dot_dimension_numbers<[1], [0], [0], [1], [0, 0, 1, 1], [], []>} : vector<8x20xbf16>, vector<20x128xbf16>, vector<8x128xf32> -> vector<8x128xf32>
    %61 = vector.broadcast %53 : vector<1x128xf32> to vector<8x128xf32>
    %62 = arith.addf %60, %61 : vector<8x128xf32>
    %cst_49 = arith.constant 0.000000e+00 : f32
    %63 = vector.broadcast %cst_49 : f32 to vector<8x128xf32>
    %64 = arith.cmpf oge, %62, %63 : vector<8x128xf32>
    %cst_50 = arith.constant 2.000000e-01 : f32
    %65 = vector.broadcast %cst_50 : f32 to vector<8x128xf32>
    %66 = arith.mulf %65, %62 : vector<8x128xf32>
    %67 = arith.select %64, %62, %66 : vector<8x128xi1>, vector<8x128xf32>
    %68 = arith.truncf %67 : vector<8x128xf32> to vector<8x128xbf16>
    %cst_51 = arith.constant dense<0.000000e+00> : vector<8x256xf32>
    %69 = tpu.matmul %68, %54, %cst_51 {dimension_numbers = #tpu.dot_dimension_numbers<[1], [0], [0], [1], [0, 0, 1, 1], [], []>} : vector<8x128xbf16>, vector<128x256xbf16>, vector<8x256xf32> -> vector<8x256xf32>
    %70 = vector.broadcast %55 : vector<1x256xf32> to vector<8x256xf32>
    %71 = arith.addf %69, %70 : vector<8x256xf32>
    %cst_52 = arith.constant 0.000000e+00 : f32
    %72 = vector.broadcast %cst_52 : f32 to vector<8x256xf32>
    %73 = arith.cmpf oge, %71, %72 : vector<8x256xf32>
    %cst_53 = arith.constant 2.000000e-01 : f32
    %74 = vector.broadcast %cst_53 : f32 to vector<8x256xf32>
    %75 = arith.mulf %74, %71 : vector<8x256xf32>
    %76 = arith.select %73, %71, %75 : vector<8x256xi1>, vector<8x256xf32>
    %77 = arith.truncf %76 : vector<8x256xf32> to vector<8x256xbf16>
    %cst_54 = arith.constant dense<0.000000e+00> : vector<8x512xf32>
    %78 = tpu.matmul %77, %56, %cst_54 {dimension_numbers = #tpu.dot_dimension_numbers<[1], [0], [0], [1], [0, 0, 1, 1], [], []>} : vector<8x256xbf16>, vector<256x512xbf16>, vector<8x512xf32> -> vector<8x512xf32>
    %79 = vector.broadcast %57 : vector<1x512xf32> to vector<8x512xf32>
    %80 = arith.addf %78, %79 : vector<8x512xf32>
    %cst_55 = arith.constant 0.000000e+00 : f32
    %81 = vector.broadcast %cst_55 : f32 to vector<8x512xf32>
    %82 = arith.cmpf oge, %80, %81 : vector<8x512xf32>
    %cst_56 = arith.constant 2.000000e-01 : f32
    %83 = vector.broadcast %cst_56 : f32 to vector<8x512xf32>
    %84 = arith.mulf %83, %80 : vector<8x512xf32>
    %85 = arith.select %82, %80, %84 : vector<8x512xi1>, vector<8x512xf32>
    %86 = arith.truncf %85 : vector<8x512xf32> to vector<8x512xbf16>
    %cst_57 = arith.constant dense<0.000000e+00> : vector<8x8xf32>
    %87 = tpu.matmul %86, %58, %cst_57 {dimension_numbers = #tpu.dot_dimension_numbers<[1], [0], [0], [1], [0, 0, 1, 1], [], []>} : vector<8x512xbf16>, vector<512x8xbf16>, vector<8x8xf32> -> vector<8x8xf32>
    %88 = vector.broadcast %59 : vector<1x8xf32> to vector<8x8xf32>
    %89 = arith.addf %87, %88 : vector<8x8xf32>
    %cst_58 = arith.constant dense<0xFF800000> : vector<8xf32>
    %90 = vector.multi_reduction <maximumf>, %89, %cst_58 [1] : vector<8x8xf32> to vector<8xf32>
    %91 = vector.shape_cast %90 : vector<8xf32> to vector<8x1xf32>
    %92 = vector.broadcast %91 : vector<8x1xf32> to vector<8x8xf32>
    %93 = arith.subf %89, %92 : vector<8x8xf32>
    %94 = math.exp %93 : vector<8x8xf32>
    %cst_59 = arith.constant dense<0.000000e+00> : vector<8xf32>
    %95 = vector.multi_reduction <add>, %94, %cst_59 [1] : vector<8x8xf32> to vector<8xf32>
    %96 = vector.shape_cast %95 : vector<8xf32> to vector<8x1xf32>
    %97 = vector.broadcast %96 : vector<8x1xf32> to vector<8x8xf32>
    %98 = arith.divf %94, %97 : vector<8x8xf32>
    %c0_60 = arith.constant 0 : index
    %c0_61 = arith.constant 0 : index
    %99 = vector.load %arg20[%c0_60, %c0_61] : memref<8x8xf32, #tpu.memory_space<vmem>>, vector<8x8xf32>
    tpu.vector_store %arg20[%c0_60, %c0_61], %98 {strides = array<i32>} : memref<8x8xf32, #tpu.memory_space<vmem>>, vector<8x8xf32>,
    return
  }
  func.func @transform_0(%arg0: i32) -> (i32, i32) {
    %c0_i32 = arith.constant 0 : i32
    %c0_i32_0 = arith.constant 0 : i32
    return %arg0, %c0_i32 : i32, i32
  }
  func.func @transform_1(%arg0: i32) -> (i32, i32) {
    %c0_i32 = arith.constant 0 : i32
    %c0_i32_0 = arith.constant 0 : i32
    return %arg0, %c0_i32 : i32, i32
  }
  func.func @transform_2(%arg0: i32) -> (i32, i32) {
    %c0_i32 = arith.constant 0 : i32
    %c0_i32_0 = arith.constant 0 : i32
    %c0_i32_1 = arith.constant 0 : i32
    return %c0_i32, %c0_i32_0 : i32, i32
  }
  func.func @transform_3(%arg0: i32) -> (i32, i32) {
    %c0_i32 = arith.constant 0 : i32
    %c0_i32_0 = arith.constant 0 : i32
    %c0_i32_1 = arith.constant 0 : i32
    return %c0_i32, %c0_i32_0 : i32, i32
  }
  func.func @transform_4(%arg0: i32) -> (i32, i32) {
    %c0_i32 = arith.constant 0 : i32
    %c0_i32_0 = arith.constant 0 : i32
    %c0_i32_1 = arith.constant 0 : i32
    return %c0_i32, %c0_i32_0 : i32, i32
  }
  func.func @transform_5(%arg0: i32) -> (i32, i32) {
    %c0_i32 = arith.constant 0 : i32
    %c0_i32_0 = arith.constant 0 : i32
    %c0_i32_1 = arith.constant 0 : i32
    return %c0_i32, %c0_i32_0 : i32, i32
  }
  func.func @transform_6(%arg0: i32) -> (i32, i32) {
    %c0_i32 = arith.constant 0 : i32
    %c0_i32_0 = arith.constant 0 : i32
    %c0_i32_1 = arith.constant 0 : i32
    return %c0_i32, %c0_i32_0 : i32, i32
  }
  func.func @transform_7(%arg0: i32) -> (i32, i32) {
    %c0_i32 = arith.constant 0 : i32
    %c0_i32_0 = arith.constant 0 : i32
    %c0_i32_1 = arith.constant 0 : i32
    return %c0_i32, %c0_i32_0 : i32, i32
  }
  func.func @transform_8(%arg0: i32) -> (i32, i32) {
    %c0_i32 = arith.constant 0 : i32
    %c0_i32_0 = arith.constant 0 : i32
    %c0_i32_1 = arith.constant 0 : i32
    return %c0_i32, %c0_i32_0 : i32, i32
  }
  func.func @transform_9(%arg0: i32) -> (i32, i32) {
    %c0_i32 = arith.constant 0 : i32
    %c0_i32_0 = arith.constant 0 : i32
    %c0_i32_1 = arith.constant 0 : i32
    return %c0_i32, %c0_i32_0 : i32, i32
  }
  func.func @transform_10(%arg0: i32) -> (i32, i32) {
    %c0_i32 = arith.constant 0 : i32
    %c0_i32_0 = arith.constant 0 : i32
    %c0_i32_1 = arith.constant 0 : i32
    return %c0_i32, %c0_i32_0 : i32, i32
  }
  func.func @transform_11(%arg0: i32) -> (i32, i32) {
    %c0_i32 = arith.constant 0 : i32
    %c0_i32_0 = arith.constant 0 : i32
    %c0_i32_1 = arith.constant 0 : i32
    return %c0_i32, %c0_i32_0 : i32, i32
  }
  func.func @transform_12(%arg0: i32) -> (i32, i32) {
    %c0_i32 = arith.constant 0 : i32
    %c0_i32_0 = arith.constant 0 : i32
    %c0_i32_1 = arith.constant 0 : i32
    return %c0_i32, %c0_i32_0 : i32, i32
  }
  func.func @transform_13(%arg0: i32) -> (i32, i32) {
    %c0_i32 = arith.constant 0 : i32
    %c0_i32_0 = arith.constant 0 : i32
    %c0_i32_1 = arith.constant 0 : i32
    return %c0_i32, %c0_i32_0 : i32, i32
  }
  func.func @transform_14(%arg0: i32) -> (i32, i32) {
    %c0_i32 = arith.constant 0 : i32
    %c0_i32_0 = arith.constant 0 : i32
    %c0_i32_1 = arith.constant 0 : i32
    return %c0_i32, %c0_i32_0 : i32, i32
  }
  func.func @transform_15(%arg0: i32) -> (i32, i32) {
    %c0_i32 = arith.constant 0 : i32
    %c0_i32_0 = arith.constant 0 : i32
    %c0_i32_1 = arith.constant 0 : i32
    return %c0_i32, %c0_i32_0 : i32, i32
  }
  func.func @transform_16(%arg0: i32) -> (i32, i32) {
    %c0_i32 = arith.constant 0 : i32
    %c0_i32_0 = arith.constant 0 : i32
    %c0_i32_1 = arith.constant 0 : i32
    return %c0_i32, %c0_i32_0 : i32, i32
  }
  func.func @transform_17(%arg0: i32) -> (i32, i32) {
    %c0_i32 = arith.constant 0 : i32
    %c0_i32_0 = arith.constant 0 : i32
    %c0_i32_1 = arith.constant 0 : i32
    return %c0_i32, %c0_i32_0 : i32, i32
  }
  func.func @transform_18(%arg0: i32) -> (i32, i32) {
    %c0_i32 = arith.constant 0 : i32
    %c0_i32_0 = arith.constant 0 : i32
    return %arg0, %c0_i32 : i32, i32
  }
  func.func @transform_19(%arg0: i32) -> (i32, i32) {
    %c0_i32 = arith.constant 0 : i32
    %c0_i32_0 = arith.constant 0 : i32
    return %arg0, %c0_i32 : i32, i32
  }
}

</mosaic_0001>

<bundles_post_ra>
// kernel: mlp_generator_forward.1
= control target key start
LH: loop header
LB: loop body
LE: loop exit
PB: predicated region body
PF: predicated region fallthrough
CT: control target
= control target key end

     0   :  { %s3743_s0 = inlined_call_operand.vmem [shape: f32[2,16], index: 0, kind: input, shape index: {}]   ;;  %s3744_s1 = inlined_call_operand.vmem [shape: f32[8,20], index: 1, kind: input, shape index: {}]   ;;  %s3745_s2 = inlined_call_operand.vmem [shape: bf16[16,128], index: 2, kind: input, shape index: {}]   ;;  %s3746_s3 = inlined_call_operand.vmem [shape: f32[1,128], index: 3, kind: input, shape index: {}]   ;;  %s3747_s4 = inlined_call_operand.hbm [shape: bf16[128,256], index: 4, kind: input, shape index: {}]   ;;  %s3748_s5 = inlined_call_operand.vmem [shape: f32[1,256], index: 5, kind: input, shape index: {}]   ;;  %s3749_s6 = inlined_call_operand.vmem [shape: bf16[256,512], index: 6, kind: input, shape index: {}]   ;;  %s3750_s7 = inlined_call_operand.vmem [shape: f32[1,512], index: 7, kind: input, shape index: {}]   ;;  %s3751_s8 = inlined_call_operand.vmem [shape: bf16[512,4], index: 8, kind: input, shape index: {}]   ;;  %s3752_s9 = inlined_call_operand.vmem [shape: f32[1,4], index: 9, kind: input, shape index: {}]   ;;  %s3753_s10 = inlined_call_operand.vmem [shape: bf16[20,128], index: 10, kind: input, shape index: {}]   ;;  %s3754_s11 = inlined_call_operand.vmem [shape: f32[1,128], index: 11, kind: input, shape index: {}]   ;;  %s3755_s12 = inlined_call_operand.hbm [shape: bf16[128,256], index: 12, kind: input, shape index: {}]   ;;  %s3756_s13 = inlined_call_operand.vmem [shape: f32[1,256], index: 13, kind: input, shape index: {}]   ;;  %s3757_s14 = inlined_call_operand.hbm [shape: bf16[256,512], index: 14, kind: input, shape index: {}]   ;;  %s3758_s15 = inlined_call_operand.vmem [shape: f32[1,512], index: 15, kind: input, shape index: {}]   ;;  %s3759_s16 = inlined_call_operand.vmem [shape: bf16[512,8], index: 16, kind: input, shape index: {}]   ;;  %s3760_s17 = inlined_call_operand.vmem [shape: f32[1,8], index: 17, kind: input, shape index: {}]   ;;  %s3761_s18 = inlined_call_operand.hbm [shape: f32[2,4], index: 18, kind: output, shape index: {0}]   ;;  %s3762_s19 = inlined_call_operand.hbm [shape: f32[8,8], index: 19, kind: output, shape index: {1}]  }
   0x1   :  { %3763 = sst [smem:[#allocation15_spill]] %s3743_s0 }
   0x2   :  { %3764 = sst [smem:[#allocation16_spill]] %s3744_s1 }
   0x3   :  { %3765 = sst [smem:[#allocation17_spill]] %s3745_s2 }
   0x4   :  { %3766 = sst [smem:[#allocation18_spill]] %s3746_s3 }
   0x5   :  { %25 = vsyncpa [#allocation3], 0 }
   0x6   :  { %26 = vsyncpa [#allocation6], 0 }
   0x7   :  { %27 = vsyncpa [#allocation4], 0 }
   0x8   :  { %28 = vsyncpa [#allocation10], 0  ;;  %s3092_s0 = smov [#allocation5]   ;;  %s3093_s20 = smov [#allocation2]  }
   0x9   :  { %s68_s30 = sshll.u32 %s3092_s0, 4  ;;  %s42_s21 = sshll.u32 %s3093_s20, 4  ;;  %s69_s30 = int_to_ptr.vmem [resolvable:$true] %s68_s30  ;;  %s3204_s21 = int_to_ptr.vmem [resolvable:$true] %s42_s21 }
   0xa   :  { %s2974_s2 = scalar_lea.hbm %s3755_s12, 2048 }
   0xb   :  { %p2975_p0 = scmp.ne.s32.totalorder %s3755_s12, %s2974_s2  ;;  %p2978_p1 = scmp.lt.u32.totalorder %s2974_s2, %s3755_s12 }
   0xd   :  { %p2980_p2 = pnand %p2978_p1, %p2975_p0 }
   0xf   :  { %2983 = shalt.err (!%p2980_p2)
}
  0x10   :  { %s2984_s26 = scalar_lea.vmem %s69_s30, 2048  ;;  %p2989_p4 = scmp.lt.s32.totalorder %s69_s30, %s69_s30 }
  0x11   :  { %p2985_p3 = scmp.ne.s32.totalorder %s69_s30, %s2984_s26  ;;  %p2990_p5 = scmp.lt.s32.totalorder %s2984_s26, %s2984_s26 }
  0x13   :  { %p2991_p6 = por %p2990_p5, %p2989_p4 }
  0x15   :  { %p2992_p7 = pnand %p2991_p6, %p2985_p3 }
  0x17   :  { %2995 = shalt.err (!%p2992_p7)
}
  0x18   :  { %s3094_s27 = smov 128   ;;  %s3095_s28 = smov 8  }
  0x19   :  { %74 = dma.hbm_to_vmem [thread:$0]  %s3755_s12, 2048, %s69_s30, [#allocation6], %s3094_s27, %s3094_s27, %s3095_s28  }
  0x1a   :  { %s2996_s22 = scalar_lea.hbm %s3747_s4, 2048 }
  0x1b   :  { %p2997_p8 = scmp.ne.s32.totalorder %s3747_s4, %s2996_s22  ;;  %p3000_p9 = scmp.lt.u32.totalorder %s2996_s22, %s3747_s4 }
  0x1d   :  { %p3002_p10 = pnand %p3000_p9, %p2997_p8 }
  0x1f   :  { %3005 = shalt.err (!%p3002_p10)
}
  0x20   :  { %s3006_s3 = scalar_lea.vmem %s3204_s21, 2048  ;;  %p3011_p12 = scmp.lt.s32.totalorder %s3204_s21, %s3204_s21 }
  0x21   :  { %p3007_p11 = scmp.ne.s32.totalorder %s3204_s21, %s3006_s3  ;;  %p3012_p13 = scmp.lt.s32.totalorder %s3006_s3, %s3006_s3 }
  0x23   :  { %p3013_p0 = por %p3012_p13, %p3011_p12 }
  0x25   :  { %p3014_p1 = pnand %p3013_p0, %p3007_p11 }
  0x27   :  { %3017 = shalt.err (!%p3014_p1)
}
  0x28   :  { %48 = dma.hbm_to_vmem [thread:$0]  %s3747_s4, 2048, %s3204_s21, [#allocation3], %s3094_s27, %s3094_s27, %s3095_s28  }
  0x29   :  { %s3096_s26 = smov [#allocation7]   ;;  %s3018_s1 = scalar_lea.hbm %s3757_s14, 8192 }
  0x2a   :  { %s82_s29 = sshll.u32 %s3096_s26, 4  ;;  %p3019_p2 = scmp.ne.s32.totalorder %s3757_s14, %s3018_s1  ;;  %s83_s29 = int_to_ptr.vmem [resolvable:$true] %s82_s29 }
  0x2b   :  { %p3022_p3 = scmp.lt.u32.totalorder %s3018_s1, %s3757_s14 }
  0x2d   :  { %p3024_p4 = pnand %p3022_p3, %p3019_p2 }
  0x2f   :  { %3027 = shalt.err (!%p3024_p4)
}
  0x30   :  { %s3028_s25 = scalar_lea.vmem %s83_s29, 8192  ;;  %p3033_p6 = scmp.lt.s32.totalorder %s83_s29, %s83_s29 }
  0x31   :  { %p3029_p5 = scmp.ne.s32.totalorder %s83_s29, %s3028_s25  ;;  %p3034_p7 = scmp.lt.s32.totalorder %s3028_s25, %s3028_s25 }
  0x33   :  { %p3035_p8 = por %p3034_p7, %p3033_p6 }
  0x35   :  { %p3036_p9 = pnand %p3035_p8, %p3029_p5 }
  0x37   :  { %3039 = shalt.err (!%p3036_p9)
}
  0x38   :  { %s3097_s4 = smov 256   ;;  %s3098_s21 = smov 16  }
  0x39   :  { %88 = dma.hbm_to_vmem [thread:$0]  %s3757_s14, 8192, %s83_s29, [#allocation6], %s3097_s4, %s3097_s4, %s3098_s21  }
  0x3a   :  { %3084 = dma.done.wait [#allocation3], 2048  }
  0x3b   :  { %3085 = vsyncadd [#allocation3], 4294965248 }
  0x3c   :  { %3086 = dma.done.wait [#allocation6], 10240  }
  0x3d   :  { %3087 = vsyncadd [#allocation6], 4294957056  ;;  %v3099_v0 = vmov 0.0   ;;  %vm3100_vm0 = vmmov 0   ;;  %s3767_s30 = sld [smem:[#allocation17_spill]]  ;;  %s3768_s20 = sld [smem:[#allocation15_spill]] }
  0x3e   :  { %2633 = vmatprep.subr.bf16.mxu1 %v3099_v0  ;;  %2635 = vmatprep.mubr.msk.bf16.mxu1 %vm3100_vm0, %v3099_v0  ;;  %vm269_vm1 = vcmask 130048   ;;  %v2660_v4 = vld [vmem:[#allocation2] ss:$8 sps:$4 sm:$0xff]   ;;  %v2662_v5 = vld [vmem:[#allocation2 + $0x4] ss:$8 sps:$4 sm:$0xff]   ;;  %v3101_v20 = vmov 0  }
  0x3f   :  { %v2665_v6 = vld [vmem:[#allocation2 + $0x14] ss:$8 sps:$4 sm:$0xff]   ;;  %v2663_v7 = vld [vmem:[#allocation2 + $0x10] ss:$8 sps:$4 sm:$0xff]   ;;  %v2668_v8 = vld [vmem:[#allocation2 + $0x24] ss:$8 sps:$4 sm:$0xff]  }
  0x40   :  { %v2666_v9 = vld [vmem:[#allocation2 + $0x20] ss:$8 sps:$4 sm:$0xff]   ;;  %v2671_v10 = vld [vmem:[#allocation2 + $0x34] ss:$8 sps:$4 sm:$0xff]   ;;  %v2669_v11 = vld [vmem:[#allocation2 + $0x30] ss:$8 sps:$4 sm:$0xff]  }
  0x41   :  { %v2674_v12 = vld [vmem:[#allocation2 + $0x44] ss:$8 sps:$4 sm:$0xff]   ;;  %v2672_v13 = vld [vmem:[#allocation2 + $0x40] ss:$8 sps:$4 sm:$0xff]   ;;  %v2677_v14 = vld [vmem:[#allocation2 + $0x54] ss:$8 sps:$4 sm:$0xff]  }
  0x42   :  { %v2675_v15 = vld [vmem:[#allocation2 + $0x50] ss:$8 sps:$4 sm:$0xff]   ;;  %v2680_v16 = vld [vmem:[#allocation2 + $0x64] ss:$8 sps:$4 sm:$0xff]   ;;  %v2678_v17 = vld [vmem:[#allocation2 + $0x60] ss:$8 sps:$4 sm:$0xff]  }
  0x43   :  { %v2659_v1 = vld [vmem:[%s3767_s30] sm:$0xff]   ;;  %v2683_v18 = vld [vmem:[#allocation2 + $0x74] ss:$8 sps:$4 sm:$0xff]   ;;  %v2681_v19 = vld [vmem:[#allocation2 + $0x70] ss:$8 sps:$4 sm:$0xff]   ;;  %s3769_s24 = sld [smem:[#allocation18_spill]] }
  0x44   :  { %v105_v2 = vld [vmem:[%s3768_s20] sm:$0x3]  ;;  %2634 = vmatpush3.bf16.msra.mxu1 %v2659_v1  ;;  %v2684_v21 = vld [vmem:[%s3749_s6 + $0x4] ss:$16 sps:$4 sm:$0xff]   ;;  %v2688_v22 = vld [vmem:[%s3749_s6 + $0xc] ss:$16 sps:$4 sm:$0xff]  }
  0x45   :  { %v106_v3 = vpack.c.bf16 %v105_v2, %v105_v2  ;;  %408 = vmatprep.subr.bf16.mxu1 %v2662_v5  ;;  %v2689_v23 = vld [vmem:[%s3749_s6] ss:$16 sps:$4 sm:$0xff]   ;;  %v2690_v24 = vld [vmem:[%s3749_s6 + $0x24] ss:$16 sps:$4 sm:$0xff]   ;;  %798 = vmatprep.subr.bf16.mxu0 %v2684_v21  ;;  %v2686_v58 = vld [vmem:[%s3749_s6 + $0x8] ss:$16 sps:$4 sm:$0xff]  }
  0x46   :  { %v2695_v25 = vld [vmem:[%s3749_s6 + $0x20] ss:$16 sps:$4 sm:$0xff]   ;;  %799 = vmatpush1.bf16.msra.mxu0 %v2689_v23  ;;  %v2696_v26 = vld [vmem:[%s3749_s6 + $0x44] ss:$16 sps:$4 sm:$0xff]   ;;  %v2694_v60 = vld [vmem:[%s3749_s6 + $0x2c] ss:$16 sps:$4 sm:$0xff]  }
  0x47   :  { %2636 = vmatmul.mubr.msk.bf16.vlgmr.msra.gmra.mrb[0].mxu1 %vm269_vm1, %v106_v3  ;;  %800 = vmatprep.subr.bf16.mxu0 %v2690_v24  ;;  %v2701_v27 = vld [vmem:[%s3749_s6 + $0x40] ss:$16 sps:$4 sm:$0xff]   ;;  %v2702_v28 = vld [vmem:[%s3749_s6 + $0x64] ss:$16 sps:$4 sm:$0xff]   ;;  %v2692_v61 = vld [vmem:[%s3749_s6 + $0x28] ss:$16 sps:$4 sm:$0xff]  }
  0x48   :  { %409 = vmatpush1.bf16.msra.mxu1 %v2660_v4  ;;  %440 = vmatprep.mubr.bf16.mxu1 %v3101_v20  ;;  %v2707_v29 = vld [vmem:[%s3749_s6 + $0x60] ss:$16 sps:$4 sm:$0xff]   ;;  %v2708_v30 = vld [vmem:[%s3749_s6 + $0x84] ss:$16 sps:$4 sm:$0xff]   ;;  %v2700_v62 = vld [vmem:[%s3749_s6 + $0x4c] ss:$16 sps:$4 sm:$0xff]  }
  0x49   :  { %410 = vmatprep.subr.bf16.mxu1 %v2665_v6  ;;  %v2713_v31 = vld [vmem:[%s3749_s6 + $0x80] ss:$16 sps:$4 sm:$0xff]   ;;  %v2714_v32 = vld [vmem:[%s3749_s6 + $0xa4] ss:$16 sps:$4 sm:$0xff]   ;;  %v2698_v63 = vld [vmem:[%s3749_s6 + $0x48] ss:$16 sps:$4 sm:$0xff]  }
  0x4a   :  { %801 = vmatpush1.bf16.msra.mxu0 %v2695_v25  ;;  %v2719_v33 = vld [vmem:[%s3749_s6 + $0xa0] ss:$16 sps:$4 sm:$0xff]   ;;  %v2720_v34 = vld [vmem:[%s3749_s6 + $0xc4] ss:$16 sps:$4 sm:$0xff]   ;;  %v2706_v1 = vld [vmem:[%s3749_s6 + $0x6c] ss:$16 sps:$4 sm:$0xff]  }
  0x4b   :  { %802 = vmatprep.subr.bf16.mxu0 %v2696_v26  ;;  %v2725_v35 = vld [vmem:[%s3749_s6 + $0xc0] ss:$16 sps:$4 sm:$0xff]   ;;  %v2726_v36 = vld [vmem:[%s3749_s6 + $0xe4] ss:$16 sps:$4 sm:$0xff]   ;;  %v2704_v2 = vld [vmem:[%s3749_s6 + $0x68] ss:$16 sps:$4 sm:$0xff]  }
  0x4c   :  { %411 = vmatpush1.bf16.msra.mxu1 %v2663_v7  ;;  %v2731_v37 = vld [vmem:[%s3749_s6 + $0xe0] ss:$16 sps:$4 sm:$0xff]   ;;  %v2732_v38 = vld [vmem:[%s3749_s6 + $0x104] ss:$16 sps:$4 sm:$0xff]   ;;  %v2712_v3 = vld [vmem:[%s3749_s6 + $0x8c] ss:$16 sps:$4 sm:$0xff]  }
  0x4d   :  { %412 = vmatprep.subr.bf16.mxu1 %v2668_v8  ;;  %v2737_v39 = vld [vmem:[%s3749_s6 + $0x100] ss:$16 sps:$4 sm:$0xff]   ;;  %v2738_v40 = vld [vmem:[%s3749_s6 + $0x124] ss:$16 sps:$4 sm:$0xff]   ;;  %v2710_v4 = vld [vmem:[%s3749_s6 + $0x88] ss:$16 sps:$4 sm:$0xff]  }
  0x4e   :  { %803 = vmatpush1.bf16.msra.mxu0 %v2701_v27  ;;  %v2743_v41 = vld [vmem:[%s3749_s6 + $0x120] ss:$16 sps:$4 sm:$0xff]   ;;  %v2744_v42 = vld [vmem:[%s3749_s6 + $0x144] ss:$16 sps:$4 sm:$0xff]   ;;  %v2718_v5 = vld [vmem:[%s3749_s6 + $0xac] ss:$16 sps:$4 sm:$0xff]  }
  0x4f   :  { %804 = vmatprep.subr.bf16.mxu0 %v2702_v28  ;;  %v2749_v43 = vld [vmem:[%s3749_s6 + $0x140] ss:$16 sps:$4 sm:$0xff]   ;;  %v2750_v44 = vld [vmem:[%s3749_s6 + $0x164] ss:$16 sps:$4 sm:$0xff]   ;;  %v2716_v6 = vld [vmem:[%s3749_s6 + $0xa8] ss:$16 sps:$4 sm:$0xff]  }
  0x50   :  { %413 = vmatpush1.bf16.msra.mxu1 %v2666_v9  ;;  %v2755_v45 = vld [vmem:[%s3749_s6 + $0x160] ss:$16 sps:$4 sm:$0xff]   ;;  %v2756_v46 = vld [vmem:[%s3749_s6 + $0x184] ss:$16 sps:$4 sm:$0xff]   ;;  %v2724_v7 = vld [vmem:[%s3749_s6 + $0xcc] ss:$16 sps:$4 sm:$0xff]  }
  0x51   :  { %414 = vmatprep.subr.bf16.mxu1 %v2671_v10  ;;  %v2761_v47 = vld [vmem:[%s3749_s6 + $0x180] ss:$16 sps:$4 sm:$0xff]   ;;  %v2762_v48 = vld [vmem:[%s3749_s6 + $0x1a4] ss:$16 sps:$4 sm:$0xff]   ;;  %v2722_v8 = vld [vmem:[%s3749_s6 + $0xc8] ss:$16 sps:$4 sm:$0xff]  }
  0x52   :  { %805 = vmatpush1.bf16.msra.mxu0 %v2707_v29  ;;  %v2767_v49 = vld [vmem:[%s3749_s6 + $0x1a0] ss:$16 sps:$4 sm:$0xff]   ;;  %v2730_v9 = vld [vmem:[%s3749_s6 + $0xec] ss:$16 sps:$4 sm:$0xff]   ;;  %v2728_v10 = vld [vmem:[%s3749_s6 + $0xe8] ss:$16 sps:$4 sm:$0xff]  }
  0x53   :  { %806 = vmatprep.subr.bf16.mxu0 %v2708_v30  ;;  %v2307_v50 = vld [vmem:[%s3769_s24] ss:$0 sm:$0xff]  ;;  %v2758_v21 = vld [vmem:[%s3749_s6 + $0x188] ss:$16 sps:$4 sm:$0xff]   ;;  %v2768_v24 = vld [vmem:[%s3749_s6 + $0x1c4] ss:$16 sps:$4 sm:$0xff]  }
  0x54   :  { %415 = vmatpush1.bf16.msra.mxu1 %v2669_v11  ;;  %v2736_v11 = vld [vmem:[%s3749_s6 + $0x10c] ss:$16 sps:$4 sm:$0xff]   ;;  %v2764_v23 = vld [vmem:[%s3749_s6 + $0x1a8] ss:$16 sps:$4 sm:$0xff]   ;;  %v2773_v27 = vld [vmem:[%s3749_s6 + $0x1c0] ss:$16 sps:$4 sm:$0xff]  }
  0x55   :  { %416 = vmatprep.subr.bf16.mxu1 %v2674_v12  ;;  %v2734_v12 = vld [vmem:[%s3749_s6 + $0x108] ss:$16 sps:$4 sm:$0xff]   ;;  %v2772_v25 = vld [vmem:[%s3749_s6 + $0x1cc] ss:$16 sps:$4 sm:$0xff]   ;;  %v2774_v28 = vld [vmem:[%s3749_s6 + $0x1e4] ss:$16 sps:$4 sm:$0xff]  }
  0x56   :  { %807 = vmatpush1.bf16.msra.mxu0 %v2713_v31  ;;  %v2770_v26 = vld [vmem:[%s3749_s6 + $0x1c8] ss:$16 sps:$4 sm:$0xff]   ;;  %v2778_v30 = vld [vmem:[%s3749_s6 + $0x1ec] ss:$16 sps:$4 sm:$0xff]   ;;  %v2779_v31 = vld [vmem:[%s3749_s6 + $0x1e0] ss:$16 sps:$4 sm:$0xff]  }
  0x57   :  { %808 = vmatprep.subr.bf16.mxu0 %v2714_v32  ;;  %v2776_v29 = vld [vmem:[%s3749_s6 + $0x1e8] ss:$16 sps:$4 sm:$0xff]   ;;  %v2780_v32 = vld [vmem:[%s3751_s8 + $0x40] sm:$0xff]   ;;  %vm1359_vm9 = vcmask 1041408   ;;  %s3770_s26 = sld [smem:[#allocation16_spill]]  ;;  %vm1355_vm10 = vcmask 162816  }
  0x58   :  { %417 = vmatpush1.bf16.msra.mxu1 %v2672_v13  ;;  %v2742_v13 = vld [vmem:[%s3749_s6 + $0x12c] ss:$16 sps:$4 sm:$0xff]   ;;  %vm1174_vm11 = vcmask 25600  }
  0x59   :  { %418 = vmatprep.subr.bf16.mxu1 %v2677_v14  ;;  %v2740_v14 = vld [vmem:[%s3749_s6 + $0x128] ss:$16 sps:$4 sm:$0xff]  }
  0x5a   :  { %809 = vmatpush1.bf16.msra.mxu0 %v2719_v33  ;;  %v2782_v33 = vld [vmem:[%s3751_s8 + $0xc0] sm:$0xff]  }
  0x5b   :  { %810 = vmatprep.subr.bf16.mxu0 %v2720_v34  ;;  %v318_v34 = vlaneseq }
  0x5c   :  { %419 = vmatpush1.bf16.msra.mxu1 %v2675_v15  ;;  %v2748_v15 = vld [vmem:[%s3749_s6 + $0x14c] ss:$16 sps:$4 sm:$0xff]  }
  0x5d   :  { %420 = vmatprep.subr.bf16.mxu1 %v2680_v16  ;;  %v2746_v16 = vld [vmem:[%s3749_s6 + $0x148] ss:$16 sps:$4 sm:$0xff]  }
  0x5e   :  { %811 = vmatpush1.bf16.msra.mxu0 %v2725_v35  ;;  %v3458_v35 = vshrl.u32 %v318_v34, 7 }
  0x5f   :  { %812 = vmatprep.subr.bf16.mxu0 %v2726_v36 }
  0x60   :  { %421 = vmatpush1.bf16.msra.mxu1 %v2678_v17  ;;  %v2754_v17 = vld [vmem:[%s3749_s6 + $0x16c] ss:$16 sps:$4 sm:$0xff]   ;;  %v3461_v36 = vsub.s32 0, %v3458_v35 }
  0x61   :  { %422 = vmatprep.subr.bf16.mxu1 %v2683_v18  ;;  %v2752_v18 = vld [vmem:[%s3749_s6 + $0x168] ss:$16 sps:$4 sm:$0xff]  }
  0x62   :  { %813 = vmatpush1.bf16.msra.mxu0 %v2731_v37  ;;  %v126_v37 = vld [vmem:[%s3748_s5] sm:$0x3] }
  0x63   :  { %814 = vmatprep.subr.bf16.mxu0 %v2732_v38  ;;  %v3467_v38 = vsub.s32 1, %v3458_v35 }
  0x64   :  { %423 = vmatpush1.bf16.msra.mxu1 %v2681_v19  ;;  %v2760_v19 = vld [vmem:[%s3749_s6 + $0x18c] ss:$16 sps:$4 sm:$0xff]  }
  0x65   :  { %839 = vmatprep.subr.bf16.mxu1 %v2688_v22  ;;  %v2766_v22 = vld [vmem:[%s3749_s6 + $0x1ac] ss:$16 sps:$4 sm:$0xff]  }
  0x66   :  { %815 = vmatpush1.bf16.msra.mxu0 %v2737_v39  ;;  %v321_v39 = vrot.slane %v126_v37, %v3461_v36 }
  0x67   :  { %816 = vmatprep.subr.bf16.mxu0 %v2738_v40  ;;  %v325_v40 = vrot.slane %v126_v37, %v3467_v38 }
  0x6a   :  { %817 = vmatpush1.bf16.msra.mxu0 %v2743_v41 }
  0x6b   :  { %818 = vmatprep.subr.bf16.mxu0 %v2744_v42 }
  0x6e   :  { %819 = vmatpush1.bf16.msra.mxu0 %v2749_v43 }
  0x6f   :  { %820 = vmatprep.subr.bf16.mxu0 %v2750_v44 }
  0x72   :  { %821 = vmatpush1.bf16.msra.mxu0 %v2755_v45 }
  0x73   :  { %822 = vmatprep.subr.bf16.mxu0 %v2756_v46 }
  0x76   :  { %823 = vmatpush1.bf16.msra.mxu0 %v2761_v47 }
  0x77   :  { %824 = vmatprep.subr.bf16.mxu0 %v2762_v48 }
  0x7a   :  { %825 = vmatpush1.bf16.msra.mxu0 %v2767_v49 }
  0x7b   :  { %826 = vmatprep.subr.bf16.mxu0 %v2768_v24 }
  0x7e   :  { %827 = vmatpush1.bf16.msra.mxu0 %v2773_v27 }
  0x7f   :  { %828 = vmatprep.subr.bf16.mxu0 %v2774_v28 }
  0x82   :  { %829 = vmatpush1.bf16.msra.mxu0 %v2779_v31 }
  0x83   :  { %2542 = vmatprep.subr.bf16.mxu0 %v2780_v32 }
 0x11a   :  { %v307_v51 = vpop.f32.mrb[0].mxu1 }
 0x11b   :  { %v308_v52 = vadd.f32 %v2307_v50, %v307_v51  ;;  %v2637_v53 = vpop.f32.mrb[1].mxu1 }
 0x11c   :  { %v310_v54 = vpop.f32.mrb[2].mxu1  ;;  %v2783_v53 = vld [vmem:[%s3751_s8 + $0x80] sm:$0xff]  }
 0x11d   :  { %vm313_vm2 = vcmp.ge.f32.partialorder %v308_v52, 0.0  ;;  %v314_v55 = vmul.f32 0.2, %v308_v52  ;;  %v2638_v56 = vpop.f32.mrb[3].mxu1 }
 0x11e   :  { %v2786_v56 = vld [vmem:[%s3751_s8 + $0xc8] sm:$0xff]  }
 0x11f   :  { %v315_v57 = vsel %vm313_vm2, %v308_v52, %v314_v55  ;;  %v2781_v52 = vld [vmem:[%s3751_s8] sm:$0xff]   ;;  %v2784_v55 = vld [vmem:[%s3751_s8 + $0x48] sm:$0xff]  }
 0x120   :  { %v316_v59 = vpack.c.bf16 %v315_v57, %v315_v57  ;;  %v2785_v57 = vld [vmem:[%s3751_s8 + $0x8] sm:$0xff]  }
 0x122   :  { %441 = vmatmul.mubr.bf16.vlgmr.msra.gmra.mrb[4].mxu1 %v316_v59  ;;  %v2788_v59 = vld [vmem:[%s3751_s8 + $0x50] sm:$0xff]  }
 0x123   :  { %840 = vmatpush1.bf16.msra.mxu1 %v2686_v58  ;;  %v2787_v58 = vld [vmem:[%s3751_s8 + $0x88] sm:$0xff]  }
 0x124   :  { %841 = vmatprep.subr.bf16.mxu1 %v2694_v60  ;;  %v2790_v60 = vld [vmem:[%s3751_s8 + $0xd0] sm:$0xff]  }
 0x127   :  { %842 = vmatpush1.bf16.msra.mxu1 %v2692_v61  ;;  %v2789_v61 = vld [vmem:[%s3751_s8 + $0x10] sm:$0xff]  }
 0x128   :  { %843 = vmatprep.subr.bf16.mxu1 %v2700_v62  ;;  %v2791_v62 = vld [vmem:[%s3751_s8 + $0x90] sm:$0xff]  }
 0x12b   :  { %844 = vmatpush1.bf16.msra.mxu1 %v2698_v63  ;;  %v2792_v63 = vld [vmem:[%s3751_s8 + $0x58] sm:$0xff]  }
 0x12c   :  { %845 = vmatprep.subr.bf16.mxu1 %v2706_v1  ;;  %v2794_v1 = vld [vmem:[%s3751_s8 + $0xd8] sm:$0xff]  }
 0x12f   :  { %846 = vmatpush1.bf16.msra.mxu1 %v2704_v2  ;;  %v2793_v2 = vld [vmem:[%s3751_s8 + $0x18] sm:$0xff]  }
 0x130   :  { %847 = vmatprep.subr.bf16.mxu1 %v2712_v3  ;;  %v2795_v3 = vld [vmem:[%s3751_s8 + $0x98] sm:$0xff]  }
 0x133   :  { %848 = vmatpush1.bf16.msra.mxu1 %v2710_v4  ;;  %v2796_v4 = vld [vmem:[%s3751_s8 + $0x60] sm:$0xff]  }
 0x134   :  { %849 = vmatprep.subr.bf16.mxu1 %v2718_v5  ;;  %v2798_v5 = vld [vmem:[%s3751_s8 + $0xe0] sm:$0xff]  }
 0x137   :  { %850 = vmatpush1.bf16.msra.mxu1 %v2716_v6  ;;  %v2797_v6 = vld [vmem:[%s3751_s8 + $0x20] sm:$0xff]  }
 0x138   :  { %851 = vmatprep.subr.bf16.mxu1 %v2724_v7  ;;  %v2799_v7 = vld [vmem:[%s3751_s8 + $0xa0] sm:$0xff]  }
 0x13b   :  { %852 = vmatpush1.bf16.msra.mxu1 %v2722_v8  ;;  %v2800_v8 = vld [vmem:[%s3751_s8 + $0x68] sm:$0xff]  }
 0x13c   :  { %853 = vmatprep.subr.bf16.mxu1 %v2730_v9  ;;  %v2802_v9 = vld [vmem:[%s3751_s8 + $0xe8] sm:$0xff]  }
 0x13f   :  { %854 = vmatpush1.bf16.msra.mxu1 %v2728_v10  ;;  %v2801_v10 = vld [vmem:[%s3751_s8 + $0x28] sm:$0xff]  }
 0x140   :  { %855 = vmatprep.subr.bf16.mxu1 %v2736_v11  ;;  %v2803_v11 = vld [vmem:[%s3751_s8 + $0xa8] sm:$0xff]  }
 0x143   :  { %856 = vmatpush1.bf16.msra.mxu1 %v2734_v12  ;;  %v2804_v12 = vld [vmem:[%s3751_s8 + $0x70] sm:$0xff]  }
 0x144   :  { %857 = vmatprep.subr.bf16.mxu1 %v2742_v13  ;;  %v2806_v13 = vld [vmem:[%s3751_s8 + $0xf0] sm:$0xff]  }
 0x147   :  { %858 = vmatpush1.bf16.msra.mxu1 %v2740_v14  ;;  %v2805_v14 = vld [vmem:[%s3751_s8 + $0x30] sm:$0xff]  }
 0x148   :  { %859 = vmatprep.subr.bf16.mxu1 %v2748_v15  ;;  %v2807_v15 = vld [vmem:[%s3751_s8 + $0xb0] sm:$0xff]  }
 0x14b   :  { %860 = vmatpush1.bf16.msra.mxu1 %v2746_v16  ;;  %v2808_v16 = vld [vmem:[%s3751_s8 + $0x78] sm:$0xff]  }
 0x14c   :  { %861 = vmatprep.subr.bf16.mxu1 %v2754_v17  ;;  %v2809_v17 = vld [vmem:[%s3751_s8 + $0x38] sm:$0xff]  }
 0x14f   :  { %862 = vmatpush1.bf16.msra.mxu1 %v2752_v18  ;;  %v2810_v18 = vld [vmem:[%s3751_s8 + $0xf8] sm:$0xff]  }
 0x150   :  { %863 = vmatprep.subr.bf16.mxu1 %v2760_v19  ;;  %v2811_v19 = vld [vmem:[%s3751_s8 + $0xb8] sm:$0xff]  }
 0x153   :  { %864 = vmatpush1.bf16.msra.mxu1 %v2758_v21  ;;  %v468_v21 = vsub.s32 2, %v3458_v35 }
 0x154   :  { %865 = vmatprep.subr.bf16.mxu1 %v2766_v22  ;;  %v191_v22 = vld [vmem:[%s3750_s7] sm:$0xf] }
 0x155   :  { %v461_v24 = vrot.slane %v191_v22, %v3461_v36 }
 0x157   :  { %866 = vmatpush1.bf16.msra.mxu1 %v2764_v23  ;;  %v472_v23 = vsub.s32 3, %v3458_v35 }
 0x158   :  { %867 = vmatprep.subr.bf16.mxu1 %v2772_v25  ;;  %v469_v25 = vrot.slane %v191_v22, %v468_v21 }
 0x159   :  { %v473_v27 = vrot.slane %v191_v22, %v472_v23 }
 0x15b   :  { %868 = vmatpush1.bf16.msra.mxu1 %v2770_v26  ;;  %v465_v26 = vrot.slane %v191_v22, %v3467_v38 }
 0x15c   :  { %869 = vmatprep.subr.bf16.mxu1 %v2778_v30 }
 0x15f   :  { %870 = vmatpush1.bf16.msra.mxu1 %v2776_v29 }
 0x160   :  { %2564 = vmatprep.subr.bf16.mxu1 %v2782_v33 }
 0x1f5   :  { %v442_v41 = vpop.f32.mrb[4].mxu1 }
 0x1f6   :  { %v443_v42 = vadd.f32 %v442_v41, %v321_v39  ;;  %v444_v43 = vpop.f32.mrb[5].mxu1 }
 0x1f7   :  { %v445_v44 = vadd.f32 %v444_v43, %v325_v40  ;;  %v446_v45 = vpop.f32.mrb[6].mxu1 }
 0x1f8   :  { %vm449_vm3 = vcmp.ge.f32.partialorder %v443_v42, 0.0  ;;  %v451_v46 = vmul.f32 0.2, %v443_v42  ;;  %v447_v47 = vpop.f32.mrb[7].mxu1 }
 0x1f9   :  { %v452_v48 = vmul.f32 0.2, %v445_v44  ;;  %vm450_vm4 = vcmp.ge.f32.partialorder %v445_v44, 0.0 }
 0x1fa   :  { %v453_v49 = vsel %vm449_vm3, %v443_v42, %v451_v46  ;;  %vm2264_vm3 = vcmask 64512  }
 0x1fb   :  { %v454_v50 = vsel %vm450_vm4, %v445_v44, %v452_v48  ;;  %v455_v54 = vpack.c.bf16 %v453_v49, %v453_v49 }
 0x1fc   :  { %v456_v51 = vpack.c.bf16 %v454_v50, %v454_v50 }
 0x1fe   :  { %830 = vmatprep.mubr.bf16.mxu0 %v456_v51  ;;  %871 = vmatprep.mubr.bf16.mxu1 %v456_v51 }
 0x1ff   :  { %831 = vmatmul.mubr.bf16.vlgmr.msra.gmra.mrb[0].mxu0 %v455_v54  ;;  %872 = vmatmul.mubr.bf16.vlgmr.msra.gmra.mrb[8].mxu1 %v455_v54 }
 0x200   :  { %2543 = vmatpush3.bf16.msra.mxu0 %v2781_v52  ;;  %2565 = vmatpush3.bf16.msra.mxu1 %v2783_v53  ;;  %v2812_v53 = vld [vmem:[%s3753_s10] sm:$0xff]  }
 0x201   :  { %2544 = vmatprep.subr.bf16.mxu0 %v2784_v55  ;;  %2566 = vmatprep.subr.bf16.mxu1 %v2786_v56  ;;  %v2813_v56 = vld [vmem:[%s3753_s10 + $0x8] ss:$0 sps:$4 sm:$0x33]  }
 0x204   :  { %2545 = vmatpush3.bf16.msra.mxu0 %v2785_v57  ;;  %2567 = vmatpush3.bf16.msra.mxu1 %v2787_v58  ;;  %v1187_v57 = vld [vmem:[%s3770_s26] sm:$0xff]  ;;  %v1361_v58 = vsel %vm1359_vm9, %v2813_v56, 0 }
 0x205   :  { %2546 = vmatprep.subr.bf16.mxu0 %v2788_v59  ;;  %2568 = vmatprep.subr.bf16.mxu1 %v2790_v60  ;;  %v2816_v59 = vld [vmem:[#allocation5 + $0x4] ss:$8 sps:$4 sm:$0xff]   ;;  %v1188_v60 = vpack.c.bf16 %v1187_v57, %v1187_v57 }
 0x206   :  { %v2864_v56 = vld [vmem:[#allocation7 + $0x84] ss:$16 sps:$4 sm:$0xff]   ;;  %v2867_v57 = vld [vmem:[#allocation7 + $0x8c] ss:$16 sps:$4 sm:$0xff]  }
 0x208   :  { %2547 = vmatpush3.bf16.msra.mxu0 %v2789_v61  ;;  %2569 = vmatpush3.bf16.msra.mxu1 %v2791_v62  ;;  %v2814_v61 = vld [vmem:[#allocation5] ss:$8 sps:$4 sm:$0xff]   ;;  %v2819_v62 = vld [vmem:[#allocation5 + $0x14] ss:$8 sps:$4 sm:$0xff]  }
 0x209   :  { %2548 = vmatprep.subr.bf16.mxu0 %v2792_v63  ;;  %2570 = vmatprep.subr.bf16.mxu1 %v2794_v1  ;;  %v2817_v63 = vld [vmem:[#allocation5 + $0x10] ss:$8 sps:$4 sm:$0xff]   ;;  %v2822_v1 = vld [vmem:[#allocation5 + $0x24] ss:$8 sps:$4 sm:$0xff]  }
 0x20c   :  { %2549 = vmatpush3.bf16.msra.mxu0 %v2793_v2  ;;  %2571 = vmatpush3.bf16.msra.mxu1 %v2795_v3  ;;  %v2820_v2 = vld [vmem:[#allocation5 + $0x20] ss:$8 sps:$4 sm:$0xff]   ;;  %v2825_v3 = vld [vmem:[#allocation5 + $0x34] ss:$8 sps:$4 sm:$0xff]  }
 0x20d   :  { %2550 = vmatprep.subr.bf16.mxu0 %v2796_v4  ;;  %2572 = vmatprep.subr.bf16.mxu1 %v2798_v5  ;;  %v2826_v4 = vld [vmem:[#allocation5 + $0x40] ss:$8 sps:$4 sm:$0xff]   ;;  %v2828_v5 = vld [vmem:[#allocation5 + $0x44] ss:$8 sps:$4 sm:$0xff]  }
 0x210   :  { %2551 = vmatpush3.bf16.msra.mxu0 %v2797_v6  ;;  %2573 = vmatpush3.bf16.msra.mxu1 %v2799_v7  ;;  %v2829_v6 = vld [vmem:[#allocation5 + $0x50] ss:$8 sps:$4 sm:$0xff]   ;;  %v2831_v7 = vld [vmem:[#allocation5 + $0x54] ss:$8 sps:$4 sm:$0xff]  }
 0x211   :  { %2552 = vmatprep.subr.bf16.mxu0 %v2800_v8  ;;  %2574 = vmatprep.subr.bf16.mxu1 %v2802_v9  ;;  %v2834_v8 = vld [vmem:[#allocation5 + $0x64] ss:$8 sps:$4 sm:$0xff]   ;;  %v2837_v9 = vld [vmem:[#allocation5 + $0x74] ss:$8 sps:$4 sm:$0xff]  }
 0x214   :  { %2553 = vmatpush3.bf16.msra.mxu0 %v2801_v10  ;;  %2575 = vmatpush3.bf16.msra.mxu1 %v2803_v11  ;;  %v2835_v10 = vld [vmem:[#allocation5 + $0x70] ss:$8 sps:$4 sm:$0xff]  }
 0x215   :  { %2554 = vmatprep.subr.bf16.mxu0 %v2804_v12  ;;  %2576 = vmatprep.subr.bf16.mxu1 %v2806_v13  ;;  %v2390_v13 = vld [vmem:[%s3752_s9] ss:$0 sm:$0xff] }
 0x218   :  { %2555 = vmatpush3.bf16.msra.mxu0 %v2805_v14  ;;  %2577 = vmatpush3.bf16.msra.mxu1 %v2807_v15 }
 0x219   :  { %2556 = vmatprep.subr.bf16.mxu0 %v2808_v16  ;;  %2578 = vmatprep.subr.bf16.mxu1 %v2810_v18 }
 0x21c   :  { %2557 = vmatpush3.bf16.msra.mxu0 %v2809_v17  ;;  %2579 = vmatpush3.bf16.msra.mxu1 %v2811_v19 }
 0x21d   :  { %2639 = vmatprep.subr.bf16.mxu0 %v3099_v0 }
 0x2d2   :  { %v832_v28 = vpop.f32.mrb[0].mxu0  ;;  %v873_v29 = vpop.f32.mrb[8].mxu1 }
 0x2d3   :  { %v833_v30 = vadd.f32 %v832_v28, %v461_v24  ;;  %v874_v31 = vadd.f32 %v873_v29, %v469_v25  ;;  %v834_v32 = vpop.f32.mrb[1].mxu0  ;;  %v875_v33 = vpop.f32.mrb[9].mxu1 }
 0x2d4   :  { %v835_v34 = vadd.f32 %v834_v32, %v465_v26  ;;  %v876_v37 = vadd.f32 %v875_v33, %v473_v27  ;;  %v836_v39 = vpop.f32.mrb[2].mxu0  ;;  %v877_v40 = vpop.f32.mrb[10].mxu1  ;;  %v2423_v26 = vld [vmem:[%s3754_s11] ss:$0 sm:$0xff] }
 0x2d5   :  { %vm880_vm5 = vcmp.ge.f32.partialorder %v833_v30, 0.0  ;;  %v884_v41 = vmul.f32 0.2, %v833_v30  ;;  %vm882_vm6 = vcmp.ge.f32.partialorder %v874_v31, 0.0  ;;  %v886_v42 = vmul.f32 0.2, %v874_v31 }
 0x2d6   :  { %vm881_vm7 = vcmp.ge.f32.partialorder %v835_v34, 0.0  ;;  %v885_v43 = vmul.f32 0.2, %v835_v34  ;;  %vm883_vm8 = vcmp.ge.f32.partialorder %v876_v37, 0.0  ;;  %v887_v44 = vmul.f32 0.2, %v876_v37 }
 0x2d7   :  { %v888_v45 = vsel %vm880_vm5, %v833_v30, %v884_v41  ;;  %v890_v46 = vsel %vm882_vm6, %v874_v31, %v886_v42  ;;  %v837_v47 = vpop.f32.mrb[3].mxu0  ;;  %v878_v48 = vpop.f32.mrb[11].mxu1  ;;  %v2838_v40 = vld [vmem:[#allocation7] ss:$16 sps:$4 sm:$0xff]   ;;  %v2840_v41 = vld [vmem:[#allocation7 + $0x4] ss:$16 sps:$4 sm:$0xff]  }
 0x2d8   :  { %v889_v49 = vsel %vm881_vm7, %v835_v34, %v885_v43  ;;  %v891_v50 = vsel %vm883_vm8, %v876_v37, %v887_v44  ;;  %v892_v54 = vpack.c.bf16 %v888_v45, %v888_v45  ;;  %v894_v55 = vpack.c.bf16 %v890_v46, %v890_v46  ;;  %v2841_v42 = vld [vmem:[#allocation7 + $0x8] ss:$16 sps:$4 sm:$0xff]   ;;  %v2843_v43 = vld [vmem:[#allocation7 + $0xc] ss:$16 sps:$4 sm:$0xff]   ;;  %v2846_v44 = vld [vmem:[#allocation7 + $0x24] ss:$16 sps:$4 sm:$0xff]   ;;  %1888 = vmatprep.subr.bf16.mxu1 %v2840_v41 }
 0x2d9   :  { %v893_v51 = vpack.c.bf16 %v889_v49, %v889_v49  ;;  %v895_v52 = vpack.c.bf16 %v891_v50, %v891_v50  ;;  %v2849_v45 = vld [vmem:[#allocation7 + $0x2c] ss:$16 sps:$4 sm:$0xff]   ;;  %v2844_v46 = vld [vmem:[#allocation7 + $0x20] ss:$16 sps:$4 sm:$0xff]   ;;  %v2847_v47 = vld [vmem:[#allocation7 + $0x28] ss:$16 sps:$4 sm:$0xff]  }
 0x2da   :  { %v2852_v48 = vld [vmem:[#allocation7 + $0x44] ss:$16 sps:$4 sm:$0xff]   ;;  %v2855_v49 = vld [vmem:[#allocation7 + $0x4c] ss:$16 sps:$4 sm:$0xff]   ;;  %v2850_v50 = vld [vmem:[#allocation7 + $0x40] ss:$16 sps:$4 sm:$0xff]  }
 0x2db   :  { %1126 = vmatprep.mubr.bf16.mxu0 %v893_v51  ;;  %1166 = vmatprep.mubr.bf16.mxu1 %v895_v52  ;;  %v2853_v51 = vld [vmem:[#allocation7 + $0x48] ss:$16 sps:$4 sm:$0xff]   ;;  %v2858_v52 = vld [vmem:[#allocation7 + $0x64] ss:$16 sps:$4 sm:$0xff]  }
 0x2dc   :  { %1127 = vmatmul.mubr.bf16.vlgmr.msra.gmra.mrb[4].mxu0 %v892_v54  ;;  %1167 = vmatmul.mubr.bf16.vlgmr.msra.gmra.mrb[12].mxu1 %v894_v55  ;;  %v2856_v54 = vld [vmem:[#allocation7 + $0x60] ss:$16 sps:$4 sm:$0xff]   ;;  %v2859_v55 = vld [vmem:[#allocation7 + $0x68] ss:$16 sps:$4 sm:$0xff]  }
 0x2dd   :  { %2640 = vmatpush3.bf16.msra.mxu0 %v2812_v53  ;;  %2643 = vmatprep.mubr.msk.bf16.mxu0 %vm3100_vm0, %v3099_v0  ;;  %v2861_v53 = vld [vmem:[#allocation7 + $0x6c] ss:$16 sps:$4 sm:$0xff]   ;;  %v2925_v41 = vld [vmem:[#allocation7 + $0x1c8] ss:$16 sps:$4 sm:$0xff]  }
 0x2de   :  { %2641 = vmatprep.subr.bf16.mxu0 %v3099_v0  ;;  %v2823_v0 = vld [vmem:[#allocation5 + $0x30] ss:$8 sps:$4 sm:$0xff]   ;;  %1889 = vmatpush1.bf16.msra.mxu1 %v2838_v40 }
 0x2df   :  { %1890 = vmatprep.subr.bf16.mxu1 %v2846_v44  ;;  %v2922_v40 = vld [vmem:[#allocation7 + $0x1c0] ss:$16 sps:$4 sm:$0xff]   ;;  %v2931_v44 = vld [vmem:[#allocation7 + $0x1e8] ss:$16 sps:$4 sm:$0xff]  }
 0x2e1   :  { %2642 = vmatpush3.bf16.msra.mxu0 %v1361_v58  ;;  %v2862_v58 = vld [vmem:[#allocation7 + $0x80] ss:$16 sps:$4 sm:$0xff]  }
 0x2e2   :  { %1498 = vmatprep.subr.bf16.mxu0 %v2816_v59  ;;  %1891 = vmatpush1.bf16.msra.mxu1 %v2844_v46  ;;  %v2865_v59 = vld [vmem:[#allocation7 + $0x88] ss:$16 sps:$4 sm:$0xff]  }
 0x2e3   :  { %1892 = vmatprep.subr.bf16.mxu1 %v2852_v48 }
 0x2e4   :  { %2644 = vmatmul.mubr.msk.bf16.vlgmr.msra.gmra.mrb[8].mxu0 %vm1355_vm10, %v1188_v60  ;;  %v2870_v60 = vld [vmem:[#allocation7 + $0xa4] ss:$16 sps:$4 sm:$0xff]  }
 0x2e5   :  { %1499 = vmatpush1.bf16.msra.mxu0 %v2814_v61  ;;  %1530 = vmatprep.mubr.bf16.mxu0 %v3101_v20  ;;  %v2832_v20 = vld [vmem:[#allocation5 + $0x60] ss:$8 sps:$4 sm:$0xff]   ;;  %v2873_v61 = vld [vmem:[#allocation7 + $0xac] ss:$16 sps:$4 sm:$0xff]  }
 0x2e6   :  { %1500 = vmatprep.subr.bf16.mxu0 %v2819_v62  ;;  %1893 = vmatpush1.bf16.msra.mxu1 %v2850_v50  ;;  %v2868_v62 = vld [vmem:[#allocation7 + $0xa0] ss:$16 sps:$4 sm:$0xff]  }
 0x2e7   :  { %1894 = vmatprep.subr.bf16.mxu1 %v2858_v52  ;;  %v2935_v52 = vld [vmem:[%s3759_s16 + $0xc0] sm:$0xff]  }
 0x2e9   :  { %1501 = vmatpush1.bf16.msra.mxu0 %v2817_v63  ;;  %v2871_v63 = vld [vmem:[#allocation7 + $0xa8] ss:$16 sps:$4 sm:$0xff]  }
 0x2ea   :  { %1502 = vmatprep.subr.bf16.mxu0 %v2822_v1  ;;  %1895 = vmatpush1.bf16.msra.mxu1 %v2856_v54  ;;  %v2876_v1 = vld [vmem:[#allocation7 + $0xc4] ss:$16 sps:$4 sm:$0xff]  }
 0x2eb   :  { %1896 = vmatprep.subr.bf16.mxu1 %v2864_v56 }
 0x2ed   :  { %1503 = vmatpush1.bf16.msra.mxu0 %v2820_v2  ;;  %v2879_v2 = vld [vmem:[#allocation7 + $0xcc] ss:$16 sps:$4 sm:$0xff]  }
 0x2ee   :  { %1504 = vmatprep.subr.bf16.mxu0 %v2825_v3  ;;  %1897 = vmatpush1.bf16.msra.mxu1 %v2862_v58  ;;  %v2874_v3 = vld [vmem:[#allocation7 + $0xc0] ss:$16 sps:$4 sm:$0xff]  }
 0x2ef   :  { %1898 = vmatprep.subr.bf16.mxu1 %v2870_v60 }
 0x2f1   :  { %1505 = vmatpush1.bf16.msra.mxu0 %v2823_v0  ;;  %v2877_v0 = vld [vmem:[#allocation7 + $0xc8] ss:$16 sps:$4 sm:$0xff]  }
 0x2f2   :  { %1506 = vmatprep.subr.bf16.mxu0 %v2828_v5  ;;  %1899 = vmatpush1.bf16.msra.mxu1 %v2868_v62  ;;  %v2885_v5 = vld [vmem:[#allocation7 + $0xec] ss:$16 sps:$4 sm:$0xff]  }
 0x2f3   :  { %1900 = vmatprep.subr.bf16.mxu1 %v2876_v1 }
 0x2f5   :  { %1507 = vmatpush1.bf16.msra.mxu0 %v2826_v4  ;;  %v2882_v4 = vld [vmem:[#allocation7 + $0xe4] ss:$16 sps:$4 sm:$0xff]  }
 0x2f6   :  { %1508 = vmatprep.subr.bf16.mxu0 %v2831_v7  ;;  %1901 = vmatpush1.bf16.msra.mxu1 %v2874_v3  ;;  %v2883_v7 = vld [vmem:[#allocation7 + $0xe8] ss:$16 sps:$4 sm:$0xff]   ;;  %v2936_v3 = vld [vmem:[%s3759_s16] sm:$0xff]  }
 0x2f7   :  { %1902 = vmatprep.subr.bf16.mxu1 %v2882_v4 }
 0x2f9   :  { %1509 = vmatpush1.bf16.msra.mxu0 %v2829_v6  ;;  %v2880_v6 = vld [vmem:[#allocation7 + $0xe0] ss:$16 sps:$4 sm:$0xff]  }
 0x2fa   :  { %1510 = vmatprep.subr.bf16.mxu0 %v2834_v8  ;;  %v2888_v8 = vld [vmem:[#allocation7 + $0x104] ss:$16 sps:$4 sm:$0xff]   ;;  %1903 = vmatpush1.bf16.msra.mxu1 %v2880_v6  ;;  %v2939_v6 = vld [vmem:[%s3759_s16 + $0xc8] sm:$0xff]  }
 0x2fb   :  { %1904 = vmatprep.subr.bf16.mxu1 %v2888_v8  ;;  %v2941_v8 = vld [vmem:[%s3759_s16 + $0x88] sm:$0xff]  }
 0x2fd   :  { %1511 = vmatpush1.bf16.msra.mxu0 %v2832_v20  ;;  %v2891_v20 = vld [vmem:[#allocation7 + $0x10c] ss:$16 sps:$4 sm:$0xff]  }
 0x2fe   :  { %1512 = vmatprep.subr.bf16.mxu0 %v2837_v9  ;;  %v2886_v9 = vld [vmem:[#allocation7 + $0x100] ss:$16 sps:$4 sm:$0xff]  }
 0x2ff   :  { %1905 = vmatpush1.bf16.msra.mxu1 %v2886_v9  ;;  %v2943_v9 = vld [vmem:[%s3759_s16 + $0xd0] sm:$0xff]  }
 0x301   :  { %1513 = vmatpush1.bf16.msra.mxu0 %v2835_v10  ;;  %v2889_v10 = vld [vmem:[#allocation7 + $0x108] ss:$16 sps:$4 sm:$0xff]  }
 0x302   :  { %1929 = vmatprep.subr.bf16.mxu0 %v2843_v43  ;;  %v2930_v43 = vld [vmem:[#allocation7 + $0x1e4] ss:$16 sps:$4 sm:$0xff]  }
 0x3af   :  { %v2558_v11 = vpop.f32.mrb[4].mxu0  ;;  %v2580_v12 = vpop.f32.mrb[12].mxu1 }
 0x3b0   :  { %v2559_v14 = vpop.f32.mrb[5].mxu0  ;;  %v2581_v15 = vpop.f32.mrb[13].mxu1 }
 0x3b1   :  { %v2560_v16 = vadd.f32 %v2559_v14, %v2558_v11  ;;  %v2582_v17 = vadd.f32 %v2581_v15, %v2580_v12  ;;  %v2561_v18 = vpop.f32.mrb[6].mxu0  ;;  %v2583_v19 = vpop.f32.mrb[14].mxu1  ;;  %v2894_v11 = vld [vmem:[#allocation7 + $0x124] ss:$16 sps:$4 sm:$0xff]   ;;  %v2897_v12 = vld [vmem:[#allocation7 + $0x12c] ss:$16 sps:$4 sm:$0xff]  }
 0x3b2   :  { %v2562_v22 = vpop.f32.mrb[7].mxu0  ;;  %v2584_v24 = vpop.f32.mrb[15].mxu1  ;;  %1906 = vmatprep.subr.bf16.mxu1 %v2894_v11  ;;  %v2895_v14 = vld [vmem:[#allocation7 + $0x128] ss:$16 sps:$4 sm:$0xff]   ;;  %v2900_v15 = vld [vmem:[#allocation7 + $0x144] ss:$16 sps:$4 sm:$0xff]  }
 0x3b3   :  { %v1129_v25 = vadd.f32 %v2560_v16, %v2390_v13  ;;  %v2892_v13 = vld [vmem:[#allocation7 + $0x120] ss:$16 sps:$4 sm:$0xff]   ;;  %v2903_v16 = vld [vmem:[#allocation7 + $0x14c] ss:$16 sps:$4 sm:$0xff]   ;;  %v2901_v18 = vld [vmem:[#allocation7 + $0x148] ss:$16 sps:$4 sm:$0xff]  }
 0x3b4   :  { %1907 = vmatpush1.bf16.msra.mxu1 %v2892_v13  ;;  %v2906_v19 = vld [vmem:[#allocation7 + $0x164] ss:$16 sps:$4 sm:$0xff]   ;;  %v2909_v22 = vld [vmem:[#allocation7 + $0x16c] ss:$16 sps:$4 sm:$0xff]   ;;  %v2904_v24 = vld [vmem:[#allocation7 + $0x160] ss:$16 sps:$4 sm:$0xff]  }
 0x3b5   :  { %v3592_v27 = vadd.f32 %v2582_v17, %v1129_v25  ;;  %v2898_v17 = vld [vmem:[#allocation7 + $0x140] ss:$16 sps:$4 sm:$0xff]   ;;  %1908 = vmatprep.subr.bf16.mxu1 %v2900_v15  ;;  %v2907_v25 = vld [vmem:[#allocation7 + $0x168] ss:$16 sps:$4 sm:$0xff]  }
 0x3b6   :  { %v2945_v11 = vld [vmem:[%s3759_s16 + $0x90] sm:$0xff]   ;;  %v2947_v13 = vld [vmem:[%s3759_s16 + $0xd8] sm:$0xff]  }
 0x3b7   :  { %v1397_v28 = vpop.f32.mrb[8].mxu0  ;;  %v1175_v29 = vsel %vm1174_vm11, %v3592_v27, -inf  ;;  %v2949_v15 = vld [vmem:[%s3759_s16 + $0x98] sm:$0xff]  }
 0x3b8   :  { %v1398_v30 = vadd.f32 %v2423_v26, %v1397_v28  ;;  %v2645_v31 = vpop.f32.mrb[9].mxu0  ;;  %1176 = vmax.xlane.f32.xlu0 %v1175_v29  ;;  %1909 = vmatpush1.bf16.msra.mxu1 %v2898_v17  ;;  %v2912_v26 = vld [vmem:[#allocation7 + $0x184] ss:$16 sps:$4 sm:$0xff]   ;;  %v2915_v28 = vld [vmem:[#allocation7 + $0x18c] ss:$16 sps:$4 sm:$0xff]  }
 0x3b9   :  { %v1400_v32 = vpop.f32.mrb[10].mxu0  ;;  %1910 = vmatprep.subr.bf16.mxu1 %v2906_v19  ;;  %v2910_v29 = vld [vmem:[#allocation7 + $0x180] ss:$16 sps:$4 sm:$0xff]   ;;  %v2918_v31 = vld [vmem:[#allocation7 + $0x1a4] ss:$16 sps:$4 sm:$0xff]  }
 0x3ba   :  { %vm1403_vm12 = vcmp.ge.f32.partialorder %v1398_v30, 0.0  ;;  %v1404_v33 = vmul.f32 0.2, %v1398_v30  ;;  %v2646_v34 = vpop.f32.mrb[11].mxu0  ;;  %v2921_v32 = vld [vmem:[#allocation7 + $0x1ac] ss:$16 sps:$4 sm:$0xff]  }
 0x3bb   :  { %v2919_v34 = vld [vmem:[#allocation7 + $0x1a8] ss:$16 sps:$4 sm:$0xff]   ;;  %v2951_v17 = vld [vmem:[%s3759_s16 + $0xe0] sm:$0xff]  }
 0x3bc   :  { %v1405_v37 = vsel %vm1403_vm12, %v1398_v30, %v1404_v33  ;;  %1911 = vmatpush1.bf16.msra.mxu1 %v2904_v24  ;;  %v2913_v30 = vld [vmem:[#allocation7 + $0x188] ss:$16 sps:$4 sm:$0xff]   ;;  %v2916_v33 = vld [vmem:[#allocation7 + $0x1a0] ss:$16 sps:$4 sm:$0xff]  }
 0x3bd   :  { %v1406_v39 = vpack.c.bf16 %v1405_v37, %v1405_v37  ;;  %1912 = vmatprep.subr.bf16.mxu1 %v2912_v26  ;;  %v2924_v37 = vld [vmem:[#allocation7 + $0x1c4] ss:$16 sps:$4 sm:$0xff]   ;;  %v2955_v24 = vld [vmem:[%s3759_s16 + $0xe8] sm:$0xff]  }
 0x3be   :  { %v2953_v19 = vld [vmem:[%s3759_s16 + $0xa0] sm:$0xff]   ;;  %v2957_v26 = vld [vmem:[%s3759_s16 + $0xa8] sm:$0xff]  }
 0x3bf   :  { %1531 = vmatmul.mubr.bf16.vlgmr.msra.gmra.mrb[12].mxu0 %v1406_v39  ;;  %v2927_v39 = vld [vmem:[#allocation7 + $0x1cc] ss:$16 sps:$4 sm:$0xff]  }
 0x3c0   :  { %1930 = vmatpush1.bf16.msra.mxu0 %v2841_v42  ;;  %1913 = vmatpush1.bf16.msra.mxu1 %v2910_v29  ;;  %v2928_v42 = vld [vmem:[#allocation7 + $0x1e0] ss:$16 sps:$4 sm:$0xff]  }
 0x3c1   :  { %1931 = vmatprep.subr.bf16.mxu0 %v2849_v45  ;;  %1914 = vmatprep.subr.bf16.mxu1 %v2918_v31  ;;  %v2933_v45 = vld [vmem:[#allocation7 + $0x1ec] ss:$16 sps:$4 sm:$0xff]   ;;  %v2958_v31 = vld [vmem:[%s3759_s16 + $0x70] sm:$0xff]  }
 0x3c4   :  { %1932 = vmatpush1.bf16.msra.mxu0 %v2847_v47  ;;  %1915 = vmatpush1.bf16.msra.mxu1 %v2916_v33  ;;  %v2960_v33 = vld [vmem:[%s3759_s16 + $0x30] sm:$0xff]  }
 0x3c5   :  { %1933 = vmatprep.subr.bf16.mxu0 %v2855_v49  ;;  %1916 = vmatprep.subr.bf16.mxu1 %v2924_v37  ;;  %v2962_v37 = vld [vmem:[%s3759_s16 + $0x78] sm:$0xff]  }
 0x3c8   :  { %1934 = vmatpush1.bf16.msra.mxu0 %v2853_v51  ;;  %1917 = vmatpush1.bf16.msra.mxu1 %v2922_v40  ;;  %v2934_v51 = vld [vmem:[%s3759_s16 + $0x40] sm:$0xff]   ;;  %v2964_v40 = vld [vmem:[%s3759_s16 + $0x38] sm:$0xff]  }
 0x3c9   :  { %1935 = vmatprep.subr.bf16.mxu0 %v2861_v53  ;;  %1918 = vmatprep.subr.bf16.mxu1 %v2930_v43 }
 0x3cc   :  { %1936 = vmatpush1.bf16.msra.mxu0 %v2859_v55  ;;  %1919 = vmatpush1.bf16.msra.mxu1 %v2928_v42  ;;  %v1274_v42 = vld [vmem:[%s3758_s15] sm:$0xf] }
 0x3cd   :  { %1937 = vmatprep.subr.bf16.mxu0 %v2867_v57  ;;  %2589 = vmatprep.subr.bf16.mxu1 %v2934_v51  ;;  %v1551_v43 = vrot.slane %v1274_v42, %v3461_v36 }
 0x3d0   :  { %1938 = vmatpush1.bf16.msra.mxu0 %v2865_v59 }
 0x3d1   :  { %1939 = vmatprep.subr.bf16.mxu0 %v2873_v61 }
 0x3d4   :  { %1940 = vmatpush1.bf16.msra.mxu0 %v2871_v63 }
 0x3d5   :  { %1941 = vmatprep.subr.bf16.mxu0 %v2879_v2 }
 0x3d8   :  { %1942 = vmatpush1.bf16.msra.mxu0 %v2877_v0  ;;  %v2937_v0 = vld [vmem:[%s3759_s16 + $0x80] sm:$0xff]  }
 0x3d9   :  { %1943 = vmatprep.subr.bf16.mxu0 %v2885_v5  ;;  %v2938_v5 = vld [vmem:[%s3759_s16 + $0x48] sm:$0xff]  }
 0x3dc   :  { %1944 = vmatpush1.bf16.msra.mxu0 %v2883_v7  ;;  %v2940_v7 = vld [vmem:[%s3759_s16 + $0x8] sm:$0xff]  }
 0x3dd   :  { %1945 = vmatprep.subr.bf16.mxu0 %v2891_v20  ;;  %v2942_v20 = vld [vmem:[%s3759_s16 + $0x50] sm:$0xff]  }
 0x3e0   :  { %1946 = vmatpush1.bf16.msra.mxu0 %v2889_v10  ;;  %v2944_v10 = vld [vmem:[%s3759_s16 + $0x10] sm:$0xff]  }
 0x3e1   :  { %1947 = vmatprep.subr.bf16.mxu0 %v2897_v12  ;;  %v2946_v12 = vld [vmem:[%s3759_s16 + $0x58] sm:$0xff]  }
 0x3e4   :  { %1948 = vmatpush1.bf16.msra.mxu0 %v2895_v14  ;;  %v2948_v14 = vld [vmem:[%s3759_s16 + $0x18] sm:$0xff]  }
 0x3e5   :  { %1949 = vmatprep.subr.bf16.mxu0 %v2903_v16  ;;  %v2950_v16 = vld [vmem:[%s3759_s16 + $0x60] sm:$0xff]  }
 0x3e8   :  { %1950 = vmatpush1.bf16.msra.mxu0 %v2901_v18  ;;  %v2952_v18 = vld [vmem:[%s3759_s16 + $0x20] sm:$0xff]  }
 0x3e9   :  { %1951 = vmatprep.subr.bf16.mxu0 %v2909_v22  ;;  %v2954_v22 = vld [vmem:[%s3759_s16 + $0x68] sm:$0xff]  }
 0x3ec   :  { %1952 = vmatpush1.bf16.msra.mxu0 %v2907_v25  ;;  %v2956_v25 = vld [vmem:[%s3759_s16 + $0x28] sm:$0xff]  }
 0x3ed   :  { %1953 = vmatprep.subr.bf16.mxu0 %v2915_v28 }
 0x3f0   :  { %1954 = vmatpush1.bf16.msra.mxu0 %v2913_v30 }
 0x3f1   :  { %1955 = vmatprep.subr.bf16.mxu0 %v2921_v32  ;;  %v2959_v32 = vld [vmem:[%s3759_s16 + $0xf0] sm:$0xff]  }
 0x3f4   :  { %1956 = vmatpush1.bf16.msra.mxu0 %v2919_v34  ;;  %v2961_v34 = vld [vmem:[%s3759_s16 + $0xb0] sm:$0xff]  }
 0x3f5   :  { %1957 = vmatprep.subr.bf16.mxu0 %v2927_v39  ;;  %v2963_v39 = vld [vmem:[%s3759_s16 + $0xf8] sm:$0xff]  }
 0x3f8   :  { %1958 = vmatpush1.bf16.msra.mxu0 %v2925_v41  ;;  %v2965_v41 = vld [vmem:[%s3759_s16 + $0xb8] sm:$0xff]  }
 0x3f9   :  { %1959 = vmatprep.subr.bf16.mxu0 %v2933_v45  ;;  %v1555_v45 = vrot.slane %v1274_v42, %v3467_v38 }
 0x3fc   :  { %1960 = vmatpush1.bf16.msra.mxu0 %v2931_v44  ;;  %v1559_v44 = vrot.slane %v1274_v42, %v468_v21 }
 0x3fd   :  { %2611 = vmatprep.subr.bf16.mxu0 %v2935_v52 }
 0x445   :  { %v1177_v46 = vpop.xlane.xlu0 %1176 }
 0x446   :  { %v1178_v47 = vsub.f32 %v3592_v27, %v1177_v46  ;;  %v1209_v27 = vld [vmem:[%s3756_s13] sm:$0x3]  ;;  %v1563_v46 = vrot.slane %v1274_v42, %v472_v23 }
 0x447   :  { %v1411_v53 = vrot.slane %v1209_v27, %v3461_v36  ;;  %v1415_v54 = vrot.slane %v1209_v27, %v3467_v38 }
 0x448   :  { %v1179_v48 = vmul.f32 1.442695, %v1178_v47 }
 0x44a   :  { %2966 = vpow2.f32 %v1179_v48 }
 0x454   :  { %v3597_v49 = vpop.eup %2966 }
 0x455   :  { %v1181_v50 = vsel %vm1174_vm11, %v3597_v49, 0.0 }
 0x456   :  { %1182 = vadd.xlane.f32.xlu1 %v1181_v50 }
 0x492   :  { %v1532_v55 = vpop.f32.mrb[12].mxu0 }
 0x493   :  { %v1533_v56 = vadd.f32 %v1532_v55, %v1411_v53  ;;  %v1534_v57 = vpop.f32.mrb[13].mxu0 }
 0x494   :  { %v1535_v58 = vadd.f32 %v1534_v57, %v1415_v54  ;;  %v1536_v59 = vpop.f32.mrb[14].mxu0 }
 0x495   :  { %vm1539_vm13 = vcmp.ge.f32.partialorder %v1533_v56, 0.0  ;;  %v1541_v60 = vmul.f32 0.2, %v1533_v56  ;;  %v1537_v61 = vpop.f32.mrb[15].mxu0 }
 0x496   :  { %vm1540_vm14 = vcmp.ge.f32.partialorder %v1535_v58, 0.0  ;;  %v1542_v62 = vmul.f32 0.2, %v1535_v58 }
 0x497   :  { %v1543_v63 = vsel %vm1539_vm13, %v1533_v56, %v1541_v60 }
 0x498   :  { %v1544_v1 = vsel %vm1540_vm14, %v1535_v58, %v1542_v62  ;;  %v1545_v4 = vpack.c.bf16 %v1543_v63, %v1543_v63 }
 0x499   :  { %v1546_v2 = vpack.c.bf16 %v1544_v1, %v1544_v1 }
 0x49b   :  { %1920 = vmatprep.mubr.bf16.mxu1 %v1546_v2  ;;  %1961 = vmatprep.mubr.bf16.mxu0 %v1546_v2 }
 0x49c   :  { %1921 = vmatmul.mubr.bf16.vlgmr.msra.gmra.mrb[16].mxu1 %v1545_v4  ;;  %1962 = vmatmul.mubr.bf16.vlgmr.msra.gmra.mrb[16].mxu0 %v1545_v4 }
 0x49d   :  { %2590 = vmatpush3.bf16.msra.mxu1 %v2936_v3  ;;  %2612 = vmatpush3.bf16.msra.mxu0 %v2937_v0  ;;  %v2507_v0 = vld [vmem:[%s3760_s17] ss:$0 sm:$0xff]  ;;  %s3102_s17 = smov [#allocation8]  }
 0x49e   :  { %2591 = vmatprep.subr.bf16.mxu1 %v2938_v5  ;;  %2613 = vmatprep.subr.bf16.mxu0 %v2939_v6  ;;  %s2283_s8 = sshll.u32 %s3102_s17, 4  ;;  %s2284_s8 = int_to_ptr.vmem [resolvable:$true] %s2283_s8 }
 0x49f   :  { %s3040_s28 = scalar_lea.vmem %s2284_s8, 32  ;;  %p3045_p11 = scmp.lt.s32.totalorder %s2284_s8, %s2284_s8 }
 0x4a0   :  { %p3041_p10 = scmp.ne.s32.totalorder %s2284_s8, %s3040_s28  ;;  %p3046_p12 = scmp.lt.s32.totalorder %s3040_s28, %s3040_s28 }
 0x4a1   :  { %2592 = vmatpush3.bf16.msra.mxu1 %v2940_v7  ;;  %2614 = vmatpush3.bf16.msra.mxu0 %v2941_v8 }
 0x4a2   :  { %2593 = vmatprep.subr.bf16.mxu1 %v2942_v20  ;;  %2615 = vmatprep.subr.bf16.mxu0 %v2943_v9  ;;  %p3047_p13 = por %p3046_p12, %p3045_p11 }
 0x4a4   :  { %p3048_p0 = pnand %p3047_p13, %p3041_p10 }
 0x4a5   :  { %2594 = vmatpush3.bf16.msra.mxu1 %v2944_v10  ;;  %2616 = vmatpush3.bf16.msra.mxu0 %v2945_v11 }
 0x4a6   :  { %2595 = vmatprep.subr.bf16.mxu1 %v2946_v12  ;;  %2617 = vmatprep.subr.bf16.mxu0 %v2947_v13 }
 0x4a9   :  { %2596 = vmatpush3.bf16.msra.mxu1 %v2948_v14  ;;  %2618 = vmatpush3.bf16.msra.mxu0 %v2949_v15 }
 0x4aa   :  { %2597 = vmatprep.subr.bf16.mxu1 %v2950_v16  ;;  %2619 = vmatprep.subr.bf16.mxu0 %v2951_v17 }
 0x4ad   :  { %2598 = vmatpush3.bf16.msra.mxu1 %v2952_v18  ;;  %2620 = vmatpush3.bf16.msra.mxu0 %v2953_v19 }
 0x4ae   :  { %2599 = vmatprep.subr.bf16.mxu1 %v2954_v22  ;;  %2621 = vmatprep.subr.bf16.mxu0 %v2955_v24 }
 0x4b1   :  { %2600 = vmatpush3.bf16.msra.mxu1 %v2956_v25  ;;  %2622 = vmatpush3.bf16.msra.mxu0 %v2957_v26 }
 0x4b2   :  { %2601 = vmatprep.subr.bf16.mxu1 %v2958_v31  ;;  %2623 = vmatprep.subr.bf16.mxu0 %v2959_v32 }
 0x4b5   :  { %2602 = vmatpush3.bf16.msra.mxu1 %v2960_v33  ;;  %2624 = vmatpush3.bf16.msra.mxu0 %v2961_v34 }
 0x4b6   :  { %2603 = vmatprep.subr.bf16.mxu1 %v2962_v37  ;;  %2625 = vmatprep.subr.bf16.mxu0 %v2963_v39 }
 0x4b9   :  { %2604 = vmatpush3.bf16.msra.mxu1 %v2964_v40  ;;  %2626 = vmatpush3.bf16.msra.mxu0 %v2965_v41 }
 0x4e3   :  { %v1183_v28 = vpop.xlane.xlu1 %1182 }
 0x4e4   :  { %2968 = vrcp.f32 %v1183_v28 }
 0x4ee   :  { %v2969_v29 = vpop.eup %2968 }
 0x4ef   :  { %v1185_v30 = vmul.f32 %v2969_v29, %v3597_v49 }
 0x4f1   :  { %1186 = vst.msk [vmem:[#allocation8] sm:$0x3] %vm1174_vm11, %v1185_v30 }
 0x56f   :  { %v1922_v47 = vpop.f32.mrb[16].mxu1  ;;  %v1963_v48 = vpop.f32.mrb[16].mxu0 }
 0x570   :  { %v1923_v49 = vadd.f32 %v1922_v47, %v1551_v43  ;;  %v1964_v50 = vadd.f32 %v1963_v48, %v1559_v44  ;;  %v1924_v51 = vpop.f32.mrb[17].mxu1  ;;  %v1965_v52 = vpop.f32.mrb[17].mxu0 }
 0x571   :  { %v1925_v27 = vadd.f32 %v1924_v51, %v1555_v45  ;;  %v1966_v53 = vadd.f32 %v1965_v52, %v1563_v46  ;;  %v1926_v54 = vpop.f32.mrb[18].mxu1  ;;  %v1967_v55 = vpop.f32.mrb[18].mxu0 }
 0x572   :  { %vm1970_vm15 = vcmp.ge.f32.partialorder %v1923_v49, 0.0  ;;  %v1974_v36 = vmul.f32 0.2, %v1923_v49  ;;  %vm1972_vm0 = vcmp.ge.f32.partialorder %v1964_v50, 0.0  ;;  %v1976_v56 = vmul.f32 0.2, %v1964_v50 }
 0x573   :  { %vm1971_vm1 = vcmp.ge.f32.partialorder %v1925_v27, 0.0  ;;  %v1975_v21 = vmul.f32 0.2, %v1925_v27  ;;  %vm1973_vm2 = vcmp.ge.f32.partialorder %v1966_v53, 0.0  ;;  %v1977_v38 = vmul.f32 0.2, %v1966_v53 }
 0x574   :  { %v1978_v35 = vsel %vm1970_vm15, %v1923_v49, %v1974_v36  ;;  %v1980_v23 = vsel %vm1972_vm0, %v1964_v50, %v1976_v56  ;;  %v1927_v57 = vpop.f32.mrb[19].mxu1  ;;  %v1968_v58 = vpop.f32.mrb[19].mxu0 }
 0x575   :  { %v1979_v59 = vsel %vm1971_vm1, %v1925_v27, %v1975_v21  ;;  %v1981_v60 = vsel %vm1973_vm2, %v1966_v53, %v1977_v38  ;;  %v1982_v63 = vpack.c.bf16 %v1978_v35, %v1978_v35  ;;  %v1984_v1 = vpack.c.bf16 %v1980_v23, %v1980_v23 }
 0x576   :  { %v1983_v61 = vpack.c.bf16 %v1979_v59, %v1979_v59  ;;  %v1985_v62 = vpack.c.bf16 %v1981_v60, %v1981_v60 }
 0x578   :  { %2216 = vmatprep.mubr.bf16.mxu1 %v1983_v61  ;;  %2256 = vmatprep.mubr.bf16.mxu0 %v1985_v62 }
 0x579   :  { %2217 = vmatmul.mubr.bf16.vlgmr.msra.gmra.mrb[20].mxu1 %v1982_v63  ;;  %2257 = vmatmul.mubr.bf16.vlgmr.msra.gmra.mrb[20].mxu0 %v1984_v1 }
 0x64c   :  { %v2605_v2 = vpop.f32.mrb[20].mxu1  ;;  %v2627_v3 = vpop.f32.mrb[20].mxu0 }
 0x64d   :  { %v2606_v4 = vpop.f32.mrb[21].mxu1  ;;  %v2628_v5 = vpop.f32.mrb[21].mxu0 }
 0x64e   :  { %v2607_v6 = vadd.f32 %v2606_v4, %v2605_v2  ;;  %v2629_v7 = vadd.f32 %v2628_v5, %v2627_v3  ;;  %v2608_v8 = vpop.f32.mrb[22].mxu1  ;;  %v2630_v20 = vpop.f32.mrb[22].mxu0 }
 0x64f   :  { %v2609_v9 = vpop.f32.mrb[23].mxu1  ;;  %v2631_v10 = vpop.f32.mrb[23].mxu0 }
 0x650   :  { %v2219_v11 = vadd.f32 %v2607_v6, %v2507_v0 }
 0x652   :  { %v2259_v12 = vadd.f32 %v2629_v7, %v2219_v11 }
 0x654   :  { %v2265_v13 = vsel %vm2264_vm3, %v2259_v12, -inf }
 0x655   :  { %2266 = vmax.xlane.f32.xlu0 %v2265_v13 }
 0x6e2   :  { %v2267_v14 = vpop.xlane.xlu0 %2266 }
 0x6e3   :  { %v2268_v15 = vsub.f32 %v2259_v12, %v2267_v14 }
 0x6e5   :  { %v2269_v16 = vmul.f32 1.442695, %v2268_v15 }
 0x6e7   :  { %2970 = vpow2.f32 %v2269_v16 }
 0x6f1   :  { %v2971_v17 = vpop.eup %2970 }
 0x6f2   :  { %v2271_v18 = vsel %vm2264_vm3, %v2971_v17, 0.0 }
 0x6f3   :  { %2272 = vadd.xlane.f32.xlu1 %v2271_v18 }
 0x6f4   :  { %3051 = shalt.err (!%p3048_p0)
}
 0x6f5   :  { %s3052_s30 = scalar_lea.hbm %s3761_s18, 32 }
 0x6f6   :  { %p3053_p1 = scmp.ne.s32.totalorder %s3761_s18, %s3052_s30  ;;  %p3056_p2 = scmp.lt.u32.totalorder %s3052_s30, %s3761_s18 }
 0x6f8   :  { %p3058_p3 = pnand %p3056_p2, %p3053_p1 }
 0x6fa   :  { %3061 = shalt.err (!%p3058_p3)
}
 0x6fb   :  { %2286 = dma.vmem_to_hbm [thread:$0]  %s2284_s8, 32, %s3761_s18, [#allocation4]  }
 0x6fc   :  { %s3103_s11 = smov [#allocation9]  }
 0x6fd   :  { %s2293_s29 = sshll.u32 %s3103_s11, 4  ;;  %s2294_s29 = int_to_ptr.vmem [resolvable:$true] %s2293_s29 }
 0x6fe   :  { %s3062_s1 = scalar_lea.vmem %s2294_s29, 128  ;;  %p3067_p5 = scmp.lt.s32.totalorder %s2294_s29, %s2294_s29 }
 0x6ff   :  { %p3063_p4 = scmp.ne.s32.totalorder %s2294_s29, %s3062_s1  ;;  %p3068_p6 = scmp.lt.s32.totalorder %s3062_s1, %s3062_s1 }
 0x701   :  { %p3069_p7 = por %p3068_p6, %p3067_p5 }
 0x703   :  { %p3070_p8 = pnand %p3069_p7, %p3063_p4 }
 0x780   :  { %v2273_v19 = vpop.xlane.xlu1 %2272 }
 0x781   :  { %2972 = vrcp.f32 %v2273_v19 }
 0x78b   :  { %v2973_v22 = vpop.eup %2972 }
 0x78c   :  { %v2275_v24 = vmul.f32 %v2973_v22, %v2971_v17 }
 0x78e   :  { %2276 = vst.msk [vmem:[#allocation9] sm:$0xff] %vm2264_vm3, %v2275_v24 }
 0x78f   :  { %3073 = shalt.err (!%p3070_p8)
}
 0x790   :  { %s3074_s18 = scalar_lea.hbm %s3762_s19, 128 }
 0x791   :  { %p3075_p9 = scmp.ne.s32.totalorder %s3762_s19, %s3074_s18  ;;  %p3078_p10 = scmp.lt.u32.totalorder %s3074_s18, %s3762_s19 }
 0x793   :  { %p3080_p11 = pnand %p3078_p10, %p3075_p9 }
 0x795   :  { %3083 = shalt.err (!%p3080_p11)
}
 0x796   :  { %2296 = dma.vmem_to_hbm [thread:$0]  %s2294_s29, 128, %s3762_s19, [#allocation10]  }
 0x797   :  { %3088 = dma.done.wait [#allocation4], 32  }
 0x798   :  { %3089 = vsyncadd [#allocation4], 4294967264 }
 0x799   :  { %3090 = dma.done.wait [#allocation10], 128  }
 0x79a   :  { %3091 = vsyncadd [#allocation10], 4294967168 }
 0x79b   :  { %2303 = vsyncpa [#allocation3], 1 }
 0x79c   :  { %2304 = vsyncpa [#allocation6], 1 }
 0x79d   :  { %2305 = vsyncpa [#allocation4], 1 }
 0x79e   :  { %2306 = vsyncpa [#allocation10], 1 }

</bundles_post_ra>
